<compile_context>
chip_gen: v5e
topology: v5e:2x2
jax: 0.10.0
libtpu: 0.0.40
codegen_flags: <defaults>
</compile_context>

<pallas_src>
import functools

import numpy as np
import jax
import jax.numpy as jnp
from jax.experimental import pallas as pl
from jax.experimental.pallas import tpu as pltpu

SUB = 8
LANE = 128
CHUNK = SUB * LANE      # 1024 voxels = one dense f32 (8, 128) tile
LAB_PACK = 4            # 4 predict (8,128) chunks per native (32,128) int8 label tile


def _dice_partial_kernel(p_ref, l_ref, num_ref, den_ref, cnt_ref,
                         num_acc, den_acc, cnt_acc):
    """Grid: (batch n [parallel], spatial split o [parallel], spatial step i [reduction]).

    p_ref : (C, TB, 8, 128)   logits slab (native dtype), TB = LAB_PACK * TBQ.
    l_ref : (1, TBQ, 32, 128) int8 labels; -1 marks spatial padding.
    *_ref : (1, C, 1) f32 partial outputs, written once at the last reduction step.
    *_acc : (C, 8, 128) f32 lane-dense VMEM accumulators (persist across i).
    """
    si = pl.program_id(2)
    C = p_ref.shape[0]
    tbq = l_ref.shape[1]

    @pl.when(si == 0)
    def _init():
        num_acc[...] = jnp.zeros_like(num_acc)
        den_acc[...] = jnp.zeros_like(den_acc)
        cnt_acc[...] = jnp.zeros_like(cnt_acc)

    # Per-class (8,128) accumulators carried in vregs across the inner loop
    # (3*C carries; fine for segmentation-sized C).
    # TODO(synk): for large C (> ~8) switch to per-chunk scratch accumulation instead.
    zero = jnp.zeros((SUB, LANE), jnp.float32)
    init = (tuple(zero for _ in range(C)),
            tuple(zero for _ in range(C)),
            tuple(zero for _ in range(C)))

    def body(q, carry):
        num_c = list(carry[0])
        den_c = list(carry[1])
        cnt_c = list(carry[2])
        lab32 = l_ref[0, q].astype(jnp.int32)            # (32,128): one int8 native tile
        for j in range(LAB_PACK):                        # 4 predict chunks per label tile
            labels = lab32[j * SUB:(j + 1) * SUB]        # (8,128), tile-aligned slice
            t = q * LAB_PACK + j
            # Numerically-stable softmax over classes, pure elementwise VALU/EUP work.
            logits = [p_ref[c, t].astype(jnp.float32) for c in range(C)]
            m = logits[0]
            for c in range(1, C):
                m = jnp.maximum(m, logits[c])
            exps = [jnp.exp(x - m) for x in logits]      # EUP
            denom = exps[0]
            for c in range(1, C):
                denom = denom + exps[c]
            # Exact reciprocal; padding mask folded in once: padded voxels (label -1)
            # never match any class, so only prob (-> prob^2) needs zeroing.
            inv = jnp.where(labels >= 0,
                            pl.reciprocal(denom, approx=False), 0.0)
            for c in range(C):
                prob = exps[c] * inv
                mask = labels == c                       # one-hot as compare+select
                num_c[c] = num_c[c] + jnp.where(mask, prob, 0.0)
                den_c[c] = den_c[c] + prob * prob        # target^2 added host-side (cnt)
                cnt_c[c] = cnt_c[c] + jnp.where(mask, 1.0, 0.0)
        return tuple(num_c), tuple(den_c), tuple(cnt_c)

    nums, dens, cnts = jax.lax.fori_loop(0, tbq, body, init)

    for c in range(C):                                   # scratch touched once per step
        num_acc[c] += nums[c]
        den_acc[c] += dens[c]
        cnt_acc[c] += cnts[c]

    @pl.when(si == pl.num_programs(2) - 1)
    def _finalize():
        # Deferred cross-lane/sublane reduce + narrow store: once per (n, split).
        num_ref[0] = jnp.sum(jnp.sum(num_acc[...], axis=2), axis=1, keepdims=True)
        den_ref[0] = jnp.sum(jnp.sum(den_acc[...], axis=2), axis=1, keepdims=True)
        cnt_ref[0] = jnp.sum(jnp.sum(cnt_acc[...], axis=2), axis=1, keepdims=True)


def _dice_partial_sums(pred_slabs, label_slabs, C, tb, so, inner):
    """pred_slabs:  (N*C, SB, 8, 128) logits (native dtype, e.g. bf16/f32).
       label_slabs: (N, SB//4, 32, 128) int8 labels, -1 = padding.
       Returns per-(n, c): sum(p*t), sum(p^2), sum(t)   (p = softmax prob, t = one-hot)."""
    N = pred_slabs.shape[0] // C
    tbq = tb // LAB_PACK
    out = jax.ShapeDtypeStruct((N * so, C, 1), jnp.float32)

    # VMEM: 2 buffers x (pred block + label block) + 3 scratch accumulators.
    # Sub-32-bit pred tiles may be stored sublane-padded in VMEM -> budget with 4 B.
    pred_pad_bytes = max(jnp.dtype(pred_slabs.dtype).itemsize, 4)
    vmem_need = 2 * tb * CHUNK * (C * pred_pad_bytes + 1) + 3 * C * SUB * LANE * 4
    vmem_limit = int(min(max(vmem_need + (4 << 20), 16 << 20), 40 << 20))

    pred_spec = pl.BlockSpec((C, tb, SUB, LANE),
                             lambda n, o, i: (n, o * inner + i, 0, 0))
    lab_spec = pl.BlockSpec((1, tbq, LAB_PACK * SUB, LANE),
                            lambda n, o, i: (n, o * inner + i, 0, 0))
    out_spec = pl.BlockSpec((1, C, 1), lambda n, o, i: (n * so + o, 0, 0))

    num, den, cnt = pl.pallas_call(
        _dice_partial_kernel,
        out_shape=(out, out, out),
        grid_spec=pltpu.PrefetchScalarGridSpec(
            num_scalar_prefetch=0,
            grid=(N, so, inner),
            in_specs=[pred_spec, lab_spec],
            out_specs=[out_spec, out_spec, out_spec],
            scratch_shapes=[pltpu.VMEM((C, SUB, LANE), jnp.float32)] * 3,
        ),
        compiler_params=pltpu.CompilerParams(
            # n and the spatial split are independent (feeds v7x's 2nd TensorCore even
            # at N=1); the innermost spatial axis is the reduction.
            dimension_semantics=("parallel", "parallel", "arbitrary"),
            vmem_limit_bytes=vmem_limit),
    )(pred_slabs, label_slabs)

    num = jnp.sum(jnp.reshape(num[:, :, 0], (N, so, C)), axis=1)
    den = jnp.sum(jnp.reshape(den[:, :, 0], (N, so, C)), axis=1)
    cnt = jnp.sum(jnp.reshape(cnt[:, :, 0], (N, so, C)), axis=1)
    return num, den, cnt


def _choose_tb(C, pred_itemsize, S, vmem_block_budget=20 << 20, tb_cap=256):
    """Pick TB (1024-voxel chunks per grid step) from a double-buffered VMEM budget."""
    per_tb = 2 * CHUNK * (C * max(pred_itemsize, 4) + 1)   # pred (padded) + int8 labels
    tb = max(LAB_PACK, int(vmem_block_budget) // per_tb)
    tb_need = -(-S // CHUNK)                               # chunks needed to cover S
    tb_need = -(-tb_need // LAB_PACK) * LAB_PACK           # round to label-tile multiple
    tb = min(tb, tb_cap, tb_need)
    return max(LAB_PACK, (tb // LAB_PACK) * LAB_PACK)


def weighted_dice_loss(predict, target, weight=None, ignore_index=None,
                       smooth=1.0, p=2, tb=None, spatial_splits=None,
                       vmem_block_budget=20 << 20):
    """Forward of WeightedDiceLoss with BinaryDiceLoss defaults
    (smooth=1, p=2, reduction='mean').

    predict: [N, C, *spatial] logits (any float dtype; bf16 passes straight through).
    target:  [N, 1, *spatial] integer label map (usual path), or
             [N, C, *spatial] hard one-hot (reduced to labels via argmax).
    """
    assert p == 2, "kernel hard-codes p=2 (BinaryDiceLoss default)"
    N, C = predict.shape[0], predict.shape[1]
    assert 2 <= C <= 127, "class ids must fit in int8"
    S = int(np.prod(predict.shape[2:]))

    if target.shape[1] != C:
        labels = jnp.reshape(target, (N, S)).astype(jnp.int8)
    else:
        # TODO(synk): genuinely soft targets with a matching channel dim are reduced to
        # hard labels via argmax; the torch module would use them as-is.
        labels = jnp.argmax(jnp.reshape(target, (N, C, S)), axis=1).astype(jnp.int8)

    if tb is None:
        tb = _choose_tb(C, jnp.dtype(predict.dtype).itemsize, S, vmem_block_budget)
    assert tb > 0 and tb % LAB_PACK == 0, "tb must be a positive multiple of 4"
    tile_s = tb * CHUNK

    n_tiles = max(1, -(-S // tile_s))
    if spatial_splits is None:
        spatial_splits = 2 if n_tiles >= 2 else 1          # feed v7x's 2nd TC at small N
    so = max(1, int(spatial_splits))
    inner = -(-n_tiles // so)
    S_pad = so * inner * tile_s

    # Pad flattened spatial dim; label -1 marks padding so the in-kernel mask keeps the
    # result exact for ragged 3D volume shapes.
    pred_flat = jnp.reshape(predict, (N, C, S))
    if S_pad != S:
        pred_flat = jnp.pad(pred_flat, ((0, 0), (0, 0), (0, S_pad - S)))
        labels = jnp.pad(labels, ((0, 0), (0, S_pad - S)), constant_values=-1)
    SB = S_pad // CHUNK
    pred_slabs = jnp.reshape(pred_flat, (N * C, SB, SUB, LANE))          # contiguous
    label_slabs = jnp.reshape(labels, (N, SB // LAB_PACK, LAB_PACK * SUB, LANE))

    num_sum, den_sum, cnt = _dice_partial_sums(pred_slabs, label_slabs, C, tb, so, inner)

    # per-(n, c) binary dice; '+ cnt' restores the sum(target^2) term dropped in-kernel.
    num = 2.0 * num_sum + smooth
    den = den_sum + cnt + smooth
    loss_nc = 1.0 - num / den                 # [N, C]
    per_class = jnp.mean(loss_nc, axis=0)     # [C]   (BinaryDiceLoss reduction='mean')

    if weight is not None:
        # NB: the reference module's weighting branch dereferences self.weights (a typo)
        # and would raise; we apply `weight` as documented instead.
        per_class = per_class * jnp.asarray(weight, dtype=jnp.float32)
    if ignore_index is not None:
        per_class = jnp.where(jnp.arange(C) != ignore_index, per_class, 0.0)
    total_loss = jnp.sum(per_class) / C

    # torch.no_grad() unique-class check, from the per-class voxel counts the kernel
    # already produced (no host sync, jit-friendly, no extra pass over the volume).
    n_unique = jnp.sum(jnp.sum(cnt, axis=0) > 0)
    # TODO(synk): forward only -- no custom_vjp, so jax.grad needs a backward kernel.
    # TODO(synk): the torch module returns a shape-(1,) tensor on the early-exit path;
    # we return a scalar on both paths for shape consistency under jit.
    return jnp.where(n_unique == C, total_loss, jnp.float32(-1.0))


def _reference(predict, labels, C, smooth=1.0):
    """Pure-JAX reference (softmax dice, reduction='mean', divided by C)."""
    N = predict.shape[0]
    probs = jax.nn.softmax(predict.astype(jnp.float32).reshape(N, C, -1), axis=1)
    onehot = jax.nn.one_hot(labels.reshape(N, -1), C, dtype=jnp.float32)   # (N, S, C)
    tg = jnp.moveaxis(onehot, -1, 1)                                       # (N, C, S)
    num = 2.0 * jnp.sum(probs * tg, axis=-1) + smooth
    den = jnp.sum(probs ** 2 + tg ** 2, axis=-1) + smooth
    loss = 1.0 - num / den
    return jnp.sum(jnp.mean(loss, axis=0)) / C


if __name__ == "__main__":
    key = jax.random.PRNGKey(0)
    k1, k2, k3, k4 = jax.random.split(key, 4)

    # --- test 1: f32 logits, int label map, spatial size (4*24*24=2304) NOT a tile
    #     multiple so the padding/masking path is exercised -------------------------
    N, C, D, H, W = 2, 4, 4, 24, 24
    predict = jax.random.normal(k1, (N, C, D, H, W), dtype=jnp.float32)
    target = jax.random.randint(k2, (N, 1, D, H, W), 0, C, dtype=jnp.int32)
    target = target.at[0, 0, 0, 0, :C].set(jnp.arange(C, dtype=jnp.int32))  # all classes

    loss1 = jax.block_until_ready(jax.jit(weighted_dice_loss)(predict, target))
    ref1 = _reference(predict, jnp.reshape(target, (N, -1)), C)
    np.testing.assert_allclose(np.asarray(loss1), np.asarray(ref1), rtol=1e-3, atol=1e-4)

    # --- test 2: bf16 logits, odd C, forced small tiles so the parallel spatial-split
    #     axis (so=2) and the multi-step inner reduction (inner=2) are exercised -----
    N2, C2, D2, H2, W2 = 1, 3, 8, 40, 40
    predict2 = jax.random.normal(k3, (N2, C2, D2, H2, W2), dtype=jnp.bfloat16)
    target2 = jax.random.randint(k4, (N2, 1, D2, H2, W2), 0, C2, dtype=jnp.int32)
    target2 = target2.at[0, 0, 0, 0, :C2].set(jnp.arange(C2, dtype=jnp.int32))

    loss_fn2 = jax.jit(functools.partial(weighted_dice_loss, tb=4, spatial_splits=2))
    loss2 = jax.block_until_ready(loss_fn2(predict2, target2))
    ref2 = _reference(predict2, jnp.reshape(target2, (N2, -1)), C2)
    np.testing.assert_allclose(np.asarray(loss2), np.asarray(ref2), rtol=2e-3, atol=2e-3)

    # --- test 3: missing class -> module's early-exit value -------------------------
    loss3 = jax.block_until_ready(
        jax.jit(weighted_dice_loss)(predict, jnp.zeros_like(target)))
    assert float(loss3) == -1.0

    print("KERNEL_OK")
</pallas_src>

<mosaic_0001>
module attributes {stable_mosaic.version = 11 : i64} {
  func.func @_dice_partial_kernel(%arg0: i32, %arg1: i32, %arg2: i32, %arg3: memref<4x4x8x128xf32, #tpu.memory_space<vmem>>, %arg4: memref<1x1x32x128xi8, #tpu.memory_space<vmem>>, %arg5: memref<1x4x1xf32, #tpu.memory_space<vmem>>, %arg6: memref<1x4x1xf32, #tpu.memory_space<vmem>>, %arg7: memref<1x4x1xf32, #tpu.memory_space<vmem>>, %arg8: memref<4x8x128xf32, #tpu.memory_space<vmem>>, %arg9: memref<4x8x128xf32, #tpu.memory_space<vmem>>, %arg10: memref<4x8x128xf32, #tpu.memory_space<vmem>>) attributes {dimension_semantics = [#tpu.dimension_semantics<parallel>, #tpu.dimension_semantics<parallel>, #tpu.dimension_semantics<arbitrary>], iteration_bounds = array<i64: 2, 1, 1>, scalar_prefetch = 0 : i64, scratch_operands = 3 : i64, tpu.core_type = #tpu.core_type<tc>, window_params = [{transform_indices = @transform_0, window_bounds = array<i64: 4, 4, 8, 128>}, {transform_indices = @transform_1, window_bounds = array<i64: 1, 1, 32, 128>}, {transform_indices = @transform_2, window_bounds = array<i64: 1, 4, 1>}, {transform_indices = @transform_3, window_bounds = array<i64: 1, 4, 1>}, {transform_indices = @transform_4, window_bounds = array<i64: 1, 4, 1>}]} {
    %c0_i32 = arith.constant 0 : i32
    %0 = arith.cmpi eq, %arg2, %c0_i32 : i32
    %1 = arith.extui %0 : i1 to i32
    %c0_i32_0 = arith.constant 0 : i32
    %2 = arith.cmpi ne, %1, %c0_i32_0 : i32
    scf.if %2 {
      %cst_200 = arith.constant 0.000000e+00 : f32
      %411 = vector.broadcast %cst_200 : f32 to vector<4x8x128xf32>
      %c0_201 = arith.constant 0 : index
      %c0_202 = arith.constant 0 : index
      %c0_203 = arith.constant 0 : index
      %412 = vector.load %arg8[%c0_201, %c0_202, %c0_203] : memref<4x8x128xf32, #tpu.memory_space<vmem>>, vector<4x8x128xf32>
      tpu.vector_store %arg8[%c0_201, %c0_202, %c0_203], %411 {strides = array<i32>} : memref<4x8x128xf32, #tpu.memory_space<vmem>>, vector<4x8x128xf32>,
      %cst_204 = arith.constant 0.000000e+00 : f32
      %413 = vector.broadcast %cst_204 : f32 to vector<4x8x128xf32>
      %c0_205 = arith.constant 0 : index
      %c0_206 = arith.constant 0 : index
      %c0_207 = arith.constant 0 : index
      %414 = vector.load %arg9[%c0_205, %c0_206, %c0_207] : memref<4x8x128xf32, #tpu.memory_space<vmem>>, vector<4x8x128xf32>
      tpu.vector_store %arg9[%c0_205, %c0_206, %c0_207], %413 {strides = array<i32>} : memref<4x8x128xf32, #tpu.memory_space<vmem>>, vector<4x8x128xf32>,
      %cst_208 = arith.constant 0.000000e+00 : f32
      %415 = vector.broadcast %cst_208 : f32 to vector<4x8x128xf32>
      %c0_209 = arith.constant 0 : index
      %c0_210 = arith.constant 0 : index
      %c0_211 = arith.constant 0 : index
      %416 = vector.load %arg10[%c0_209, %c0_210, %c0_211] : memref<4x8x128xf32, #tpu.memory_space<vmem>>, vector<4x8x128xf32>
      tpu.vector_store %arg10[%c0_209, %c0_210, %c0_211], %415 {strides = array<i32>} : memref<4x8x128xf32, #tpu.memory_space<vmem>>, vector<4x8x128xf32>,
    } else {
    }
    %cst = arith.constant 0.000000e+00 : f32
    %3 = vector.broadcast %cst : f32 to vector<8x128xf32>
    %c0_i32_1 = arith.constant 0 : i32
    %c0 = arith.constant 0 : index
    %4 = arith.index_cast %c0_i32_1 : i32 to index
    %c0_2 = arith.constant 0 : index
    %c0_3 = arith.constant 0 : index
    %5 = vector.load %arg4[%c0, %4, %c0_2, %c0_3] : memref<1x1x32x128xi8, #tpu.memory_space<vmem>>, vector<1x1x32x128xi8>
    %6 = vector.shape_cast %5 : vector<1x1x32x128xi8> to vector<32x128xi8>
    %7 = arith.extsi %6 : vector<32x128xi8> to vector<32x128xi32>
    %8 = vector.extract_strided_slice %7 {offsets = [0, 0], sizes = [8, 128], strides = [1, 1]} : vector<32x128xi32> to vector<8x128xi32>
    %c4_i32 = arith.constant 4 : i32
    %9 = arith.muli %c0_i32_1, %c4_i32 : i32
    %c0_i32_4 = arith.constant 0 : i32
    %10 = arith.addi %9, %c0_i32_4 : i32
    %c0_5 = arith.constant 0 : index
    %11 = arith.index_cast %10 : i32 to index
    %c0_6 = arith.constant 0 : index
    %c0_7 = arith.constant 0 : index
    %12 = vector.load %arg3[%c0_5, %11, %c0_6, %c0_7] : memref<4x4x8x128xf32, #tpu.memory_space<vmem>>, vector<1x1x8x128xf32>
    %13 = vector.shape_cast %12 : vector<1x1x8x128xf32> to vector<8x128xf32>
    %c1 = arith.constant 1 : index
    %14 = arith.index_cast %10 : i32 to index
    %c0_8 = arith.constant 0 : index
    %c0_9 = arith.constant 0 : index
    %15 = vector.load %arg3[%c1, %14, %c0_8, %c0_9] : memref<4x4x8x128xf32, #tpu.memory_space<vmem>>, vector<1x1x8x128xf32>
    %16 = vector.shape_cast %15 : vector<1x1x8x128xf32> to vector<8x128xf32>
    %c2 = arith.constant 2 : index
    %17 = arith.index_cast %10 : i32 to index
    %c0_10 = arith.constant 0 : index
    %c0_11 = arith.constant 0 : index
    %18 = vector.load %arg3[%c2, %17, %c0_10, %c0_11] : memref<4x4x8x128xf32, #tpu.memory_space<vmem>>, vector<1x1x8x128xf32>
    %19 = vector.shape_cast %18 : vector<1x1x8x128xf32> to vector<8x128xf32>
    %c3 = arith.constant 3 : index
    %20 = arith.index_cast %10 : i32 to index
    %c0_12 = arith.constant 0 : index
    %c0_13 = arith.constant 0 : index
    %21 = vector.load %arg3[%c3, %20, %c0_12, %c0_13] : memref<4x4x8x128xf32, #tpu.memory_space<vmem>>, vector<1x1x8x128xf32>
    %22 = vector.shape_cast %21 : vector<1x1x8x128xf32> to vector<8x128xf32>
    %23 = arith.maximumf %13, %16 : vector<8x128xf32>
    %24 = arith.maximumf %23, %19 : vector<8x128xf32>
    %25 = arith.maximumf %24, %22 : vector<8x128xf32>
    %26 = arith.subf %13, %25 : vector<8x128xf32>
    %27 = math.exp %26 : vector<8x128xf32>
    %28 = arith.subf %16, %25 : vector<8x128xf32>
    %29 = math.exp %28 : vector<8x128xf32>
    %30 = arith.subf %19, %25 : vector<8x128xf32>
    %31 = math.exp %30 : vector<8x128xf32>
    %32 = arith.subf %22, %25 : vector<8x128xf32>
    %33 = math.exp %32 : vector<8x128xf32>
    %34 = arith.addf %27, %29 : vector<8x128xf32>
    %35 = arith.addf %34, %31 : vector<8x128xf32>
    %36 = arith.addf %35, %33 : vector<8x128xf32>
    %c0_i32_14 = arith.constant 0 : i32
    %37 = vector.broadcast %c0_i32_14 : i32 to vector<8x128xi32>
    %38 = arith.cmpi sge, %8, %37 : vector<8x128xi32>
    %39 = tpu.reciprocal %36 : vector<8x128xf32> -> vector<8x128xf32>
    %cst_15 = arith.constant 0.000000e+00 : f32
    %40 = vector.broadcast %cst_15 : f32 to vector<8x128xf32>
    %41 = arith.select %38, %39, %40 : vector<8x128xi1>, vector<8x128xf32>
    %42 = arith.mulf %27, %41 : vector<8x128xf32>
    %c0_i32_16 = arith.constant 0 : i32
    %43 = vector.broadcast %c0_i32_16 : i32 to vector<8x128xi32>
    %44 = arith.cmpi eq, %8, %43 : vector<8x128xi32>
    %cst_17 = arith.constant 0.000000e+00 : f32
    %45 = vector.broadcast %cst_17 : f32 to vector<8x128xf32>
    %46 = arith.select %44, %42, %45 : vector<8x128xi1>, vector<8x128xf32>
    %47 = arith.addf %3, %46 : vector<8x128xf32>
    %48 = arith.mulf %42, %42 : vector<8x128xf32>
    %49 = arith.addf %3, %48 : vector<8x128xf32>
    %cst_18 = arith.constant 1.000000e+00 : f32
    %cst_19 = arith.constant 0.000000e+00 : f32
    %50 = vector.broadcast %cst_18 : f32 to vector<8x128xf32>
    %51 = vector.broadcast %cst_19 : f32 to vector<8x128xf32>
    %52 = arith.select %44, %50, %51 : vector<8x128xi1>, vector<8x128xf32>
    %53 = arith.addf %3, %52 : vector<8x128xf32>
    %54 = arith.mulf %29, %41 : vector<8x128xf32>
    %c1_i32 = arith.constant 1 : i32
    %55 = vector.broadcast %c1_i32 : i32 to vector<8x128xi32>
    %56 = arith.cmpi eq, %8, %55 : vector<8x128xi32>
    %cst_20 = arith.constant 0.000000e+00 : f32
    %57 = vector.broadcast %cst_20 : f32 to vector<8x128xf32>
    %58 = arith.select %56, %54, %57 : vector<8x128xi1>, vector<8x128xf32>
    %59 = arith.addf %3, %58 : vector<8x128xf32>
    %60 = arith.mulf %54, %54 : vector<8x128xf32>
    %61 = arith.addf %3, %60 : vector<8x128xf32>
    %cst_21 = arith.constant 1.000000e+00 : f32
    %cst_22 = arith.constant 0.000000e+00 : f32
    %62 = vector.broadcast %cst_21 : f32 to vector<8x128xf32>
    %63 = vector.broadcast %cst_22 : f32 to vector<8x128xf32>
    %64 = arith.select %56, %62, %63 : vector<8x128xi1>, vector<8x128xf32>
    %65 = arith.addf %3, %64 : vector<8x128xf32>
    %66 = arith.mulf %31, %41 : vector<8x128xf32>
    %c2_i32 = arith.constant 2 : i32
    %67 = vector.broadcast %c2_i32 : i32 to vector<8x128xi32>
    %68 = arith.cmpi eq, %8, %67 : vector<8x128xi32>
    %cst_23 = arith.constant 0.000000e+00 : f32
    %69 = vector.broadcast %cst_23 : f32 to vector<8x128xf32>
    %70 = arith.select %68, %66, %69 : vector<8x128xi1>, vector<8x128xf32>
    %71 = arith.addf %3, %70 : vector<8x128xf32>
    %72 = arith.mulf %66, %66 : vector<8x128xf32>
    %73 = arith.addf %3, %72 : vector<8x128xf32>
    %cst_24 = arith.constant 1.000000e+00 : f32
    %cst_25 = arith.constant 0.000000e+00 : f32
    %74 = vector.broadcast %cst_24 : f32 to vector<8x128xf32>
    %75 = vector.broadcast %cst_25 : f32 to vector<8x128xf32>
    %76 = arith.select %68, %74, %75 : vector<8x128xi1>, vector<8x128xf32>
    %77 = arith.addf %3, %76 : vector<8x128xf32>
    %78 = arith.mulf %33, %41 : vector<8x128xf32>
    %c3_i32 = arith.constant 3 : i32
    %79 = vector.broadcast %c3_i32 : i32 to vector<8x128xi32>
    %80 = arith.cmpi eq, %8, %79 : vector<8x128xi32>
    %cst_26 = arith.constant 0.000000e+00 : f32
    %81 = vector.broadcast %cst_26 : f32 to vector<8x128xf32>
    %82 = arith.select %80, %78, %81 : vector<8x128xi1>, vector<8x128xf32>
    %83 = arith.addf %3, %82 : vector<8x128xf32>
    %84 = arith.mulf %78, %78 : vector<8x128xf32>
    %85 = arith.addf %3, %84 : vector<8x128xf32>
    %cst_27 = arith.constant 1.000000e+00 : f32
    %cst_28 = arith.constant 0.000000e+00 : f32
    %86 = vector.broadcast %cst_27 : f32 to vector<8x128xf32>
    %87 = vector.broadcast %cst_28 : f32 to vector<8x128xf32>
    %88 = arith.select %80, %86, %87 : vector<8x128xi1>, vector<8x128xf32>
    %89 = arith.addf %3, %88 : vector<8x128xf32>
    %90 = vector.extract_strided_slice %7 {offsets = [8, 0], sizes = [8, 128], strides = [1, 1]} : vector<32x128xi32> to vector<8x128xi32>
    %c4_i32_29 = arith.constant 4 : i32
    %91 = arith.muli %c0_i32_1, %c4_i32_29 : i32
    %c1_i32_30 = arith.constant 1 : i32
    %92 = arith.addi %91, %c1_i32_30 : i32
    %c0_31 = arith.constant 0 : index
    %93 = arith.index_cast %92 : i32 to index
    %c0_32 = arith.constant 0 : index
    %c0_33 = arith.constant 0 : index
    %94 = vector.load %arg3[%c0_31, %93, %c0_32, %c0_33] : memref<4x4x8x128xf32, #tpu.memory_space<vmem>>, vector<1x1x8x128xf32>
    %95 = vector.shape_cast %94 : vector<1x1x8x128xf32> to vector<8x128xf32>
    %c1_34 = arith.constant 1 : index
    %96 = arith.index_cast %92 : i32 to index
    %c0_35 = arith.constant 0 : index
    %c0_36 = arith.constant 0 : index
    %97 = vector.load %arg3[%c1_34, %96, %c0_35, %c0_36] : memref<4x4x8x128xf32, #tpu.memory_space<vmem>>, vector<1x1x8x128xf32>
    %98 = vector.shape_cast %97 : vector<1x1x8x128xf32> to vector<8x128xf32>
    %c2_37 = arith.constant 2 : index
    %99 = arith.index_cast %92 : i32 to index
    %c0_38 = arith.constant 0 : index
    %c0_39 = arith.constant 0 : index
    %100 = vector.load %arg3[%c2_37, %99, %c0_38, %c0_39] : memref<4x4x8x128xf32, #tpu.memory_space<vmem>>, vector<1x1x8x128xf32>
    %101 = vector.shape_cast %100 : vector<1x1x8x128xf32> to vector<8x128xf32>
    %c3_40 = arith.constant 3 : index
    %102 = arith.index_cast %92 : i32 to index
    %c0_41 = arith.constant 0 : index
    %c0_42 = arith.constant 0 : index
    %103 = vector.load %arg3[%c3_40, %102, %c0_41, %c0_42] : memref<4x4x8x128xf32, #tpu.memory_space<vmem>>, vector<1x1x8x128xf32>
    %104 = vector.shape_cast %103 : vector<1x1x8x128xf32> to vector<8x128xf32>
    %105 = arith.maximumf %95, %98 : vector<8x128xf32>
    %106 = arith.maximumf %105, %101 : vector<8x128xf32>
    %107 = arith.maximumf %106, %104 : vector<8x128xf32>
    %108 = arith.subf %95, %107 : vector<8x128xf32>
    %109 = math.exp %108 : vector<8x128xf32>
    %110 = arith.subf %98, %107 : vector<8x128xf32>
    %111 = math.exp %110 : vector<8x128xf32>
    %112 = arith.subf %101, %107 : vector<8x128xf32>
    %113 = math.exp %112 : vector<8x128xf32>
    %114 = arith.subf %104, %107 : vector<8x128xf32>
    %115 = math.exp %114 : vector<8x128xf32>
    %116 = arith.addf %109, %111 : vector<8x128xf32>
    %117 = arith.addf %116, %113 : vector<8x128xf32>
    %118 = arith.addf %117, %115 : vector<8x128xf32>
    %c0_i32_43 = arith.constant 0 : i32
    %119 = vector.broadcast %c0_i32_43 : i32 to vector<8x128xi32>
    %120 = arith.cmpi sge, %90, %119 : vector<8x128xi32>
    %121 = tpu.reciprocal %118 : vector<8x128xf32> -> vector<8x128xf32>
    %cst_44 = arith.constant 0.000000e+00 : f32
    %122 = vector.broadcast %cst_44 : f32 to vector<8x128xf32>
    %123 = arith.select %120, %121, %122 : vector<8x128xi1>, vector<8x128xf32>
    %124 = arith.mulf %109, %123 : vector<8x128xf32>
    %c0_i32_45 = arith.constant 0 : i32
    %125 = vector.broadcast %c0_i32_45 : i32 to vector<8x128xi32>
    %126 = arith.cmpi eq, %90, %125 : vector<8x128xi32>
    %cst_46 = arith.constant 0.000000e+00 : f32
    %127 = vector.broadcast %cst_46 : f32 to vector<8x128xf32>
    %128 = arith.select %126, %124, %127 : vector<8x128xi1>, vector<8x128xf32>
    %129 = arith.addf %47, %128 : vector<8x128xf32>
    %130 = arith.mulf %124, %124 : vector<8x128xf32>
    %131 = arith.addf %49, %130 : vector<8x128xf32>
    %cst_47 = arith.constant 1.000000e+00 : f32
    %cst_48 = arith.constant 0.000000e+00 : f32
    %132 = vector.broadcast %cst_47 : f32 to vector<8x128xf32>
    %133 = vector.broadcast %cst_48 : f32 to vector<8x128xf32>
    %134 = arith.select %126, %132, %133 : vector<8x128xi1>, vector<8x128xf32>
    %135 = arith.addf %53, %134 : vector<8x128xf32>
    %136 = arith.mulf %111, %123 : vector<8x128xf32>
    %c1_i32_49 = arith.constant 1 : i32
    %137 = vector.broadcast %c1_i32_49 : i32 to vector<8x128xi32>
    %138 = arith.cmpi eq, %90, %137 : vector<8x128xi32>
    %cst_50 = arith.constant 0.000000e+00 : f32
    %139 = vector.broadcast %cst_50 : f32 to vector<8x128xf32>
    %140 = arith.select %138, %136, %139 : vector<8x128xi1>, vector<8x128xf32>
    %141 = arith.addf %59, %140 : vector<8x128xf32>
    %142 = arith.mulf %136, %136 : vector<8x128xf32>
    %143 = arith.addf %61, %142 : vector<8x128xf32>
    %cst_51 = arith.constant 1.000000e+00 : f32
    %cst_52 = arith.constant 0.000000e+00 : f32
    %144 = vector.broadcast %cst_51 : f32 to vector<8x128xf32>
    %145 = vector.broadcast %cst_52 : f32 to vector<8x128xf32>
    %146 = arith.select %138, %144, %145 : vector<8x128xi1>, vector<8x128xf32>
    %147 = arith.addf %65, %146 : vector<8x128xf32>
    %148 = arith.mulf %113, %123 : vector<8x128xf32>
    %c2_i32_53 = arith.constant 2 : i32
    %149 = vector.broadcast %c2_i32_53 : i32 to vector<8x128xi32>
    %150 = arith.cmpi eq, %90, %149 : vector<8x128xi32>
    %cst_54 = arith.constant 0.000000e+00 : f32
    %151 = vector.broadcast %cst_54 : f32 to vector<8x128xf32>
    %152 = arith.select %150, %148, %151 : vector<8x128xi1>, vector<8x128xf32>
    %153 = arith.addf %71, %152 : vector<8x128xf32>
    %154 = arith.mulf %148, %148 : vector<8x128xf32>
    %155 = arith.addf %73, %154 : vector<8x128xf32>
    %cst_55 = arith.constant 1.000000e+00 : f32
    %cst_56 = arith.constant 0.000000e+00 : f32
    %156 = vector.broadcast %cst_55 : f32 to vector<8x128xf32>
    %157 = vector.broadcast %cst_56 : f32 to vector<8x128xf32>
    %158 = arith.select %150, %156, %157 : vector<8x128xi1>, vector<8x128xf32>
    %159 = arith.addf %77, %158 : vector<8x128xf32>
    %160 = arith.mulf %115, %123 : vector<8x128xf32>
    %c3_i32_57 = arith.constant 3 : i32
    %161 = vector.broadcast %c3_i32_57 : i32 to vector<8x128xi32>
    %162 = arith.cmpi eq, %90, %161 : vector<8x128xi32>
    %cst_58 = arith.constant 0.000000e+00 : f32
    %163 = vector.broadcast %cst_58 : f32 to vector<8x128xf32>
    %164 = arith.select %162, %160, %163 : vector<8x128xi1>, vector<8x128xf32>
    %165 = arith.addf %83, %164 : vector<8x128xf32>
    %166 = arith.mulf %160, %160 : vector<8x128xf32>
    %167 = arith.addf %85, %166 : vector<8x128xf32>
    %cst_59 = arith.constant 1.000000e+00 : f32
    %cst_60 = arith.constant 0.000000e+00 : f32
    %168 = vector.broadcast %cst_59 : f32 to vector<8x128xf32>
    %169 = vector.broadcast %cst_60 : f32 to vector<8x128xf32>
    %170 = arith.select %162, %168, %169 : vector<8x128xi1>, vector<8x128xf32>
    %171 = arith.addf %89, %170 : vector<8x128xf32>
    %172 = vector.extract_strided_slice %7 {offsets = [16, 0], sizes = [8, 128], strides = [1, 1]} : vector<32x128xi32> to vector<8x128xi32>
    %c4_i32_61 = arith.constant 4 : i32
    %173 = arith.muli %c0_i32_1, %c4_i32_61 : i32
    %c2_i32_62 = arith.constant 2 : i32
    %174 = arith.addi %173, %c2_i32_62 : i32
    %c0_63 = arith.constant 0 : index
    %175 = arith.index_cast %174 : i32 to index
    %c0_64 = arith.constant 0 : index
    %c0_65 = arith.constant 0 : index
    %176 = vector.load %arg3[%c0_63, %175, %c0_64, %c0_65] : memref<4x4x8x128xf32, #tpu.memory_space<vmem>>, vector<1x1x8x128xf32>
    %177 = vector.shape_cast %176 : vector<1x1x8x128xf32> to vector<8x128xf32>
    %c1_66 = arith.constant 1 : index
    %178 = arith.index_cast %174 : i32 to index
    %c0_67 = arith.constant 0 : index
    %c0_68 = arith.constant 0 : index
    %179 = vector.load %arg3[%c1_66, %178, %c0_67, %c0_68] : memref<4x4x8x128xf32, #tpu.memory_space<vmem>>, vector<1x1x8x128xf32>
    %180 = vector.shape_cast %179 : vector<1x1x8x128xf32> to vector<8x128xf32>
    %c2_69 = arith.constant 2 : index
    %181 = arith.index_cast %174 : i32 to index
    %c0_70 = arith.constant 0 : index
    %c0_71 = arith.constant 0 : index
    %182 = vector.load %arg3[%c2_69, %181, %c0_70, %c0_71] : memref<4x4x8x128xf32, #tpu.memory_space<vmem>>, vector<1x1x8x128xf32>
    %183 = vector.shape_cast %182 : vector<1x1x8x128xf32> to vector<8x128xf32>
    %c3_72 = arith.constant 3 : index
    %184 = arith.index_cast %174 : i32 to index
    %c0_73 = arith.constant 0 : index
    %c0_74 = arith.constant 0 : index
    %185 = vector.load %arg3[%c3_72, %184, %c0_73, %c0_74] : memref<4x4x8x128xf32, #tpu.memory_space<vmem>>, vector<1x1x8x128xf32>
    %186 = vector.shape_cast %185 : vector<1x1x8x128xf32> to vector<8x128xf32>
    %187 = arith.maximumf %177, %180 : vector<8x128xf32>
    %188 = arith.maximumf %187, %183 : vector<8x128xf32>
    %189 = arith.maximumf %188, %186 : vector<8x128xf32>
    %190 = arith.subf %177, %189 : vector<8x128xf32>
    %191 = math.exp %190 : vector<8x128xf32>
    %192 = arith.subf %180, %189 : vector<8x128xf32>
    %193 = math.exp %192 : vector<8x128xf32>
    %194 = arith.subf %183, %189 : vector<8x128xf32>
    %195 = math.exp %194 : vector<8x128xf32>
    %196 = arith.subf %186, %189 : vector<8x128xf32>
    %197 = math.exp %196 : vector<8x128xf32>
    %198 = arith.addf %191, %193 : vector<8x128xf32>
    %199 = arith.addf %198, %195 : vector<8x128xf32>
    %200 = arith.addf %199, %197 : vector<8x128xf32>
    %c0_i32_75 = arith.constant 0 : i32
    %201 = vector.broadcast %c0_i32_75 : i32 to vector<8x128xi32>
    %202 = arith.cmpi sge, %172, %201 : vector<8x128xi32>
    %203 = tpu.reciprocal %200 : vector<8x128xf32> -> vector<8x128xf32>
    %cst_76 = arith.constant 0.000000e+00 : f32
    %204 = vector.broadcast %cst_76 : f32 to vector<8x128xf32>
    %205 = arith.select %202, %203, %204 : vector<8x128xi1>, vector<8x128xf32>
    %206 = arith.mulf %191, %205 : vector<8x128xf32>
    %c0_i32_77 = arith.constant 0 : i32
    %207 = vector.broadcast %c0_i32_77 : i32 to vector<8x128xi32>
    %208 = arith.cmpi eq, %172, %207 : vector<8x128xi32>
    %cst_78 = arith.constant 0.000000e+00 : f32
    %209 = vector.broadcast %cst_78 : f32 to vector<8x128xf32>
    %210 = arith.select %208, %206, %209 : vector<8x128xi1>, vector<8x128xf32>
    %211 = arith.addf %129, %210 : vector<8x128xf32>
    %212 = arith.mulf %206, %206 : vector<8x128xf32>
    %213 = arith.addf %131, %212 : vector<8x128xf32>
    %cst_79 = arith.constant 1.000000e+00 : f32
    %cst_80 = arith.constant 0.000000e+00 : f32
    %214 = vector.broadcast %cst_79 : f32 to vector<8x128xf32>
    %215 = vector.broadcast %cst_80 : f32 to vector<8x128xf32>
    %216 = arith.select %208, %214, %215 : vector<8x128xi1>, vector<8x128xf32>
    %217 = arith.addf %135, %216 : vector<8x128xf32>
    %218 = arith.mulf %193, %205 : vector<8x128xf32>
    %c1_i32_81 = arith.constant 1 : i32
    %219 = vector.broadcast %c1_i32_81 : i32 to vector<8x128xi32>
    %220 = arith.cmpi eq, %172, %219 : vector<8x128xi32>
    %cst_82 = arith.constant 0.000000e+00 : f32
    %221 = vector.broadcast %cst_82 : f32 to vector<8x128xf32>
    %222 = arith.select %220, %218, %221 : vector<8x128xi1>, vector<8x128xf32>
    %223 = arith.addf %141, %222 : vector<8x128xf32>
    %224 = arith.mulf %218, %218 : vector<8x128xf32>
    %225 = arith.addf %143, %224 : vector<8x128xf32>
    %cst_83 = arith.constant 1.000000e+00 : f32
    %cst_84 = arith.constant 0.000000e+00 : f32
    %226 = vector.broadcast %cst_83 : f32 to vector<8x128xf32>
    %227 = vector.broadcast %cst_84 : f32 to vector<8x128xf32>
    %228 = arith.select %220, %226, %227 : vector<8x128xi1>, vector<8x128xf32>
    %229 = arith.addf %147, %228 : vector<8x128xf32>
    %230 = arith.mulf %195, %205 : vector<8x128xf32>
    %c2_i32_85 = arith.constant 2 : i32
    %231 = vector.broadcast %c2_i32_85 : i32 to vector<8x128xi32>
    %232 = arith.cmpi eq, %172, %231 : vector<8x128xi32>
    %cst_86 = arith.constant 0.000000e+00 : f32
    %233 = vector.broadcast %cst_86 : f32 to vector<8x128xf32>
    %234 = arith.select %232, %230, %233 : vector<8x128xi1>, vector<8x128xf32>
    %235 = arith.addf %153, %234 : vector<8x128xf32>
    %236 = arith.mulf %230, %230 : vector<8x128xf32>
    %237 = arith.addf %155, %236 : vector<8x128xf32>
    %cst_87 = arith.constant 1.000000e+00 : f32
    %cst_88 = arith.constant 0.000000e+00 : f32
    %238 = vector.broadcast %cst_87 : f32 to vector<8x128xf32>
    %239 = vector.broadcast %cst_88 : f32 to vector<8x128xf32>
    %240 = arith.select %232, %238, %239 : vector<8x128xi1>, vector<8x128xf32>
    %241 = arith.addf %159, %240 : vector<8x128xf32>
    %242 = arith.mulf %197, %205 : vector<8x128xf32>
    %c3_i32_89 = arith.constant 3 : i32
    %243 = vector.broadcast %c3_i32_89 : i32 to vector<8x128xi32>
    %244 = arith.cmpi eq, %172, %243 : vector<8x128xi32>
    %cst_90 = arith.constant 0.000000e+00 : f32
    %245 = vector.broadcast %cst_90 : f32 to vector<8x128xf32>
    %246 = arith.select %244, %242, %245 : vector<8x128xi1>, vector<8x128xf32>
    %247 = arith.addf %165, %246 : vector<8x128xf32>
    %248 = arith.mulf %242, %242 : vector<8x128xf32>
    %249 = arith.addf %167, %248 : vector<8x128xf32>
    %cst_91 = arith.constant 1.000000e+00 : f32
    %cst_92 = arith.constant 0.000000e+00 : f32
    %250 = vector.broadcast %cst_91 : f32 to vector<8x128xf32>
    %251 = vector.broadcast %cst_92 : f32 to vector<8x128xf32>
    %252 = arith.select %244, %250, %251 : vector<8x128xi1>, vector<8x128xf32>
    %253 = arith.addf %171, %252 : vector<8x128xf32>
    %254 = vector.extract_strided_slice %7 {offsets = [24, 0], sizes = [8, 128], strides = [1, 1]} : vector<32x128xi32> to vector<8x128xi32>
    %c4_i32_93 = arith.constant 4 : i32
    %255 = arith.muli %c0_i32_1, %c4_i32_93 : i32
    %c3_i32_94 = arith.constant 3 : i32
    %256 = arith.addi %255, %c3_i32_94 : i32
    %c0_95 = arith.constant 0 : index
    %257 = arith.index_cast %256 : i32 to index
    %c0_96 = arith.constant 0 : index
    %c0_97 = arith.constant 0 : index
    %258 = vector.load %arg3[%c0_95, %257, %c0_96, %c0_97] : memref<4x4x8x128xf32, #tpu.memory_space<vmem>>, vector<1x1x8x128xf32>
    %259 = vector.shape_cast %258 : vector<1x1x8x128xf32> to vector<8x128xf32>
    %c1_98 = arith.constant 1 : index
    %260 = arith.index_cast %256 : i32 to index
    %c0_99 = arith.constant 0 : index
    %c0_100 = arith.constant 0 : index
    %261 = vector.load %arg3[%c1_98, %260, %c0_99, %c0_100] : memref<4x4x8x128xf32, #tpu.memory_space<vmem>>, vector<1x1x8x128xf32>
    %262 = vector.shape_cast %261 : vector<1x1x8x128xf32> to vector<8x128xf32>
    %c2_101 = arith.constant 2 : index
    %263 = arith.index_cast %256 : i32 to index
    %c0_102 = arith.constant 0 : index
    %c0_103 = arith.constant 0 : index
    %264 = vector.load %arg3[%c2_101, %263, %c0_102, %c0_103] : memref<4x4x8x128xf32, #tpu.memory_space<vmem>>, vector<1x1x8x128xf32>
    %265 = vector.shape_cast %264 : vector<1x1x8x128xf32> to vector<8x128xf32>
    %c3_104 = arith.constant 3 : index
    %266 = arith.index_cast %256 : i32 to index
    %c0_105 = arith.constant 0 : index
    %c0_106 = arith.constant 0 : index
    %267 = vector.load %arg3[%c3_104, %266, %c0_105, %c0_106] : memref<4x4x8x128xf32, #tpu.memory_space<vmem>>, vector<1x1x8x128xf32>
    %268 = vector.shape_cast %267 : vector<1x1x8x128xf32> to vector<8x128xf32>
    %269 = arith.maximumf %259, %262 : vector<8x128xf32>
    %270 = arith.maximumf %269, %265 : vector<8x128xf32>
    %271 = arith.maximumf %270, %268 : vector<8x128xf32>
    %272 = arith.subf %259, %271 : vector<8x128xf32>
    %273 = math.exp %272 : vector<8x128xf32>
    %274 = arith.subf %262, %271 : vector<8x128xf32>
    %275 = math.exp %274 : vector<8x128xf32>
    %276 = arith.subf %265, %271 : vector<8x128xf32>
    %277 = math.exp %276 : vector<8x128xf32>
    %278 = arith.subf %268, %271 : vector<8x128xf32>
    %279 = math.exp %278 : vector<8x128xf32>
    %280 = arith.addf %273, %275 : vector<8x128xf32>
    %281 = arith.addf %280, %277 : vector<8x128xf32>
    %282 = arith.addf %281, %279 : vector<8x128xf32>
    %c0_i32_107 = arith.constant 0 : i32
    %283 = vector.broadcast %c0_i32_107 : i32 to vector<8x128xi32>
    %284 = arith.cmpi sge, %254, %283 : vector<8x128xi32>
    %285 = tpu.reciprocal %282 : vector<8x128xf32> -> vector<8x128xf32>
    %cst_108 = arith.constant 0.000000e+00 : f32
    %286 = vector.broadcast %cst_108 : f32 to vector<8x128xf32>
    %287 = arith.select %284, %285, %286 : vector<8x128xi1>, vector<8x128xf32>
    %288 = arith.mulf %273, %287 : vector<8x128xf32>
    %c0_i32_109 = arith.constant 0 : i32
    %289 = vector.broadcast %c0_i32_109 : i32 to vector<8x128xi32>
    %290 = arith.cmpi eq, %254, %289 : vector<8x128xi32>
    %cst_110 = arith.constant 0.000000e+00 : f32
    %291 = vector.broadcast %cst_110 : f32 to vector<8x128xf32>
    %292 = arith.select %290, %288, %291 : vector<8x128xi1>, vector<8x128xf32>
    %293 = arith.addf %211, %292 : vector<8x128xf32>
    %294 = arith.mulf %288, %288 : vector<8x128xf32>
    %295 = arith.addf %213, %294 : vector<8x128xf32>
    %cst_111 = arith.constant 1.000000e+00 : f32
    %cst_112 = arith.constant 0.000000e+00 : f32
    %296 = vector.broadcast %cst_111 : f32 to vector<8x128xf32>
    %297 = vector.broadcast %cst_112 : f32 to vector<8x128xf32>
    %298 = arith.select %290, %296, %297 : vector<8x128xi1>, vector<8x128xf32>
    %299 = arith.addf %217, %298 : vector<8x128xf32>
    %300 = arith.mulf %275, %287 : vector<8x128xf32>
    %c1_i32_113 = arith.constant 1 : i32
    %301 = vector.broadcast %c1_i32_113 : i32 to vector<8x128xi32>
    %302 = arith.cmpi eq, %254, %301 : vector<8x128xi32>
    %cst_114 = arith.constant 0.000000e+00 : f32
    %303 = vector.broadcast %cst_114 : f32 to vector<8x128xf32>
    %304 = arith.select %302, %300, %303 : vector<8x128xi1>, vector<8x128xf32>
    %305 = arith.addf %223, %304 : vector<8x128xf32>
    %306 = arith.mulf %300, %300 : vector<8x128xf32>
    %307 = arith.addf %225, %306 : vector<8x128xf32>
    %cst_115 = arith.constant 1.000000e+00 : f32
    %cst_116 = arith.constant 0.000000e+00 : f32
    %308 = vector.broadcast %cst_115 : f32 to vector<8x128xf32>
    %309 = vector.broadcast %cst_116 : f32 to vector<8x128xf32>
    %310 = arith.select %302, %308, %309 : vector<8x128xi1>, vector<8x128xf32>
    %311 = arith.addf %229, %310 : vector<8x128xf32>
    %312 = arith.mulf %277, %287 : vector<8x128xf32>
    %c2_i32_117 = arith.constant 2 : i32
    %313 = vector.broadcast %c2_i32_117 : i32 to vector<8x128xi32>
    %314 = arith.cmpi eq, %254, %313 : vector<8x128xi32>
    %cst_118 = arith.constant 0.000000e+00 : f32
    %315 = vector.broadcast %cst_118 : f32 to vector<8x128xf32>
    %316 = arith.select %314, %312, %315 : vector<8x128xi1>, vector<8x128xf32>
    %317 = arith.addf %235, %316 : vector<8x128xf32>
    %318 = arith.mulf %312, %312 : vector<8x128xf32>
    %319 = arith.addf %237, %318 : vector<8x128xf32>
    %cst_119 = arith.constant 1.000000e+00 : f32
    %cst_120 = arith.constant 0.000000e+00 : f32
    %320 = vector.broadcast %cst_119 : f32 to vector<8x128xf32>
    %321 = vector.broadcast %cst_120 : f32 to vector<8x128xf32>
    %322 = arith.select %314, %320, %321 : vector<8x128xi1>, vector<8x128xf32>
    %323 = arith.addf %241, %322 : vector<8x128xf32>
    %324 = arith.mulf %279, %287 : vector<8x128xf32>
    %c3_i32_121 = arith.constant 3 : i32
    %325 = vector.broadcast %c3_i32_121 : i32 to vector<8x128xi32>
    %326 = arith.cmpi eq, %254, %325 : vector<8x128xi32>
    %cst_122 = arith.constant 0.000000e+00 : f32
    %327 = vector.broadcast %cst_122 : f32 to vector<8x128xf32>
    %328 = arith.select %326, %324, %327 : vector<8x128xi1>, vector<8x128xf32>
    %329 = arith.addf %247, %328 : vector<8x128xf32>
    %330 = arith.mulf %324, %324 : vector<8x128xf32>
    %331 = arith.addf %249, %330 : vector<8x128xf32>
    %cst_123 = arith.constant 1.000000e+00 : f32
    %cst_124 = arith.constant 0.000000e+00 : f32
    %332 = vector.broadcast %cst_123 : f32 to vector<8x128xf32>
    %333 = vector.broadcast %cst_124 : f32 to vector<8x128xf32>
    %334 = arith.select %326, %332, %333 : vector<8x128xi1>, vector<8x128xf32>
    %335 = arith.addf %253, %334 : vector<8x128xf32>
    %c1_i32_125 = arith.constant 1 : i32
    %c0_126 = arith.constant 0 : index
    %c0_127 = arith.constant 0 : index
    %c0_128 = arith.constant 0 : index
    %336 = vector.load %arg8[%c0_126, %c0_127, %c0_128] : memref<4x8x128xf32, #tpu.memory_space<vmem>>, vector<1x8x128xf32>
    %337 = vector.shape_cast %336 : vector<1x8x128xf32> to vector<8x128xf32>
    %338 = arith.addf %337, %293 : vector<8x128xf32>
    %c0_129 = arith.constant 0 : index
    %c0_130 = arith.constant 0 : index
    %c0_131 = arith.constant 0 : index
    %339 = vector.load %arg8[%c0_129, %c0_130, %c0_131] : memref<4x8x128xf32, #tpu.memory_space<vmem>>, vector<1x8x128xf32>
    %340 = vector.shape_cast %339 : vector<1x8x128xf32> to vector<8x128xf32>
    %341 = vector.shape_cast %338 : vector<8x128xf32> to vector<1x8x128xf32>
    tpu.vector_store %arg8[%c0_129, %c0_130, %c0_131], %341 {strides = array<i32>} : memref<4x8x128xf32, #tpu.memory_space<vmem>>, vector<1x8x128xf32>,
    %c0_132 = arith.constant 0 : index
    %c0_133 = arith.constant 0 : index
    %c0_134 = arith.constant 0 : index
    %342 = vector.load %arg9[%c0_132, %c0_133, %c0_134] : memref<4x8x128xf32, #tpu.memory_space<vmem>>, vector<1x8x128xf32>
    %343 = vector.shape_cast %342 : vector<1x8x128xf32> to vector<8x128xf32>
    %344 = arith.addf %343, %295 : vector<8x128xf32>
    %c0_135 = arith.constant 0 : index
    %c0_136 = arith.constant 0 : index
    %c0_137 = arith.constant 0 : index
    %345 = vector.load %arg9[%c0_135, %c0_136, %c0_137] : memref<4x8x128xf32, #tpu.memory_space<vmem>>, vector<1x8x128xf32>
    %346 = vector.shape_cast %345 : vector<1x8x128xf32> to vector<8x128xf32>
    %347 = vector.shape_cast %344 : vector<8x128xf32> to vector<1x8x128xf32>
    tpu.vector_store %arg9[%c0_135, %c0_136, %c0_137], %347 {strides = array<i32>} : memref<4x8x128xf32, #tpu.memory_space<vmem>>, vector<1x8x128xf32>,
    %c0_138 = arith.constant 0 : index
    %c0_139 = arith.constant 0 : index
    %c0_140 = arith.constant 0 : index
    %348 = vector.load %arg10[%c0_138, %c0_139, %c0_140] : memref<4x8x128xf32, #tpu.memory_space<vmem>>, vector<1x8x128xf32>
    %349 = vector.shape_cast %348 : vector<1x8x128xf32> to vector<8x128xf32>
    %350 = arith.addf %349, %299 : vector<8x128xf32>
    %c0_141 = arith.constant 0 : index
    %c0_142 = arith.constant 0 : index
    %c0_143 = arith.constant 0 : index
    %351 = vector.load %arg10[%c0_141, %c0_142, %c0_143] : memref<4x8x128xf32, #tpu.memory_space<vmem>>, vector<1x8x128xf32>
    %352 = vector.shape_cast %351 : vector<1x8x128xf32> to vector<8x128xf32>
    %353 = vector.shape_cast %350 : vector<8x128xf32> to vector<1x8x128xf32>
    tpu.vector_store %arg10[%c0_141, %c0_142, %c0_143], %353 {strides = array<i32>} : memref<4x8x128xf32, #tpu.memory_space<vmem>>, vector<1x8x128xf32>,
    %c1_144 = arith.constant 1 : index
    %c0_145 = arith.constant 0 : index
    %c0_146 = arith.constant 0 : index
    %354 = vector.load %arg8[%c1_144, %c0_145, %c0_146] : memref<4x8x128xf32, #tpu.memory_space<vmem>>, vector<1x8x128xf32>
    %355 = vector.shape_cast %354 : vector<1x8x128xf32> to vector<8x128xf32>
    %356 = arith.addf %355, %305 : vector<8x128xf32>
    %c1_147 = arith.constant 1 : index
    %c0_148 = arith.constant 0 : index
    %c0_149 = arith.constant 0 : index
    %357 = vector.load %arg8[%c1_147, %c0_148, %c0_149] : memref<4x8x128xf32, #tpu.memory_space<vmem>>, vector<1x8x128xf32>
    %358 = vector.shape_cast %357 : vector<1x8x128xf32> to vector<8x128xf32>
    %359 = vector.shape_cast %356 : vector<8x128xf32> to vector<1x8x128xf32>
    tpu.vector_store %arg8[%c1_147, %c0_148, %c0_149], %359 {strides = array<i32>} : memref<4x8x128xf32, #tpu.memory_space<vmem>>, vector<1x8x128xf32>,
    %c1_150 = arith.constant 1 : index
    %c0_151 = arith.constant 0 : index
    %c0_152 = arith.constant 0 : index
    %360 = vector.load %arg9[%c1_150, %c0_151, %c0_152] : memref<4x8x128xf32, #tpu.memory_space<vmem>>, vector<1x8x128xf32>
    %361 = vector.shape_cast %360 : vector<1x8x128xf32> to vector<8x128xf32>
    %362 = arith.addf %361, %307 : vector<8x128xf32>
    %c1_153 = arith.constant 1 : index
    %c0_154 = arith.constant 0 : index
    %c0_155 = arith.constant 0 : index
    %363 = vector.load %arg9[%c1_153, %c0_154, %c0_155] : memref<4x8x128xf32, #tpu.memory_space<vmem>>, vector<1x8x128xf32>
    %364 = vector.shape_cast %363 : vector<1x8x128xf32> to vector<8x128xf32>
    %365 = vector.shape_cast %362 : vector<8x128xf32> to vector<1x8x128xf32>
    tpu.vector_store %arg9[%c1_153, %c0_154, %c0_155], %365 {strides = array<i32>} : memref<4x8x128xf32, #tpu.memory_space<vmem>>, vector<1x8x128xf32>,
    %c1_156 = arith.constant 1 : index
    %c0_157 = arith.constant 0 : index
    %c0_158 = arith.constant 0 : index
    %366 = vector.load %arg10[%c1_156, %c0_157, %c0_158] : memref<4x8x128xf32, #tpu.memory_space<vmem>>, vector<1x8x128xf32>
    %367 = vector.shape_cast %366 : vector<1x8x128xf32> to vector<8x128xf32>
    %368 = arith.addf %367, %311 : vector<8x128xf32>
    %c1_159 = arith.constant 1 : index
    %c0_160 = arith.constant 0 : index
    %c0_161 = arith.constant 0 : index
    %369 = vector.load %arg10[%c1_159, %c0_160, %c0_161] : memref<4x8x128xf32, #tpu.memory_space<vmem>>, vector<1x8x128xf32>
    %370 = vector.shape_cast %369 : vector<1x8x128xf32> to vector<8x128xf32>
    %371 = vector.shape_cast %368 : vector<8x128xf32> to vector<1x8x128xf32>
    tpu.vector_store %arg10[%c1_159, %c0_160, %c0_161], %371 {strides = array<i32>} : memref<4x8x128xf32, #tpu.memory_space<vmem>>, vector<1x8x128xf32>,
    %c2_162 = arith.constant 2 : index
    %c0_163 = arith.constant 0 : index
    %c0_164 = arith.constant 0 : index
    %372 = vector.load %arg8[%c2_162, %c0_163, %c0_164] : memref<4x8x128xf32, #tpu.memory_space<vmem>>, vector<1x8x128xf32>
    %373 = vector.shape_cast %372 : vector<1x8x128xf32> to vector<8x128xf32>
    %374 = arith.addf %373, %317 : vector<8x128xf32>
    %c2_165 = arith.constant 2 : index
    %c0_166 = arith.constant 0 : index
    %c0_167 = arith.constant 0 : index
    %375 = vector.load %arg8[%c2_165, %c0_166, %c0_167] : memref<4x8x128xf32, #tpu.memory_space<vmem>>, vector<1x8x128xf32>
    %376 = vector.shape_cast %375 : vector<1x8x128xf32> to vector<8x128xf32>
    %377 = vector.shape_cast %374 : vector<8x128xf32> to vector<1x8x128xf32>
    tpu.vector_store %arg8[%c2_165, %c0_166, %c0_167], %377 {strides = array<i32>} : memref<4x8x128xf32, #tpu.memory_space<vmem>>, vector<1x8x128xf32>,
    %c2_168 = arith.constant 2 : index
    %c0_169 = arith.constant 0 : index
    %c0_170 = arith.constant 0 : index
    %378 = vector.load %arg9[%c2_168, %c0_169, %c0_170] : memref<4x8x128xf32, #tpu.memory_space<vmem>>, vector<1x8x128xf32>
    %379 = vector.shape_cast %378 : vector<1x8x128xf32> to vector<8x128xf32>
    %380 = arith.addf %379, %319 : vector<8x128xf32>
    %c2_171 = arith.constant 2 : index
    %c0_172 = arith.constant 0 : index
    %c0_173 = arith.constant 0 : index
    %381 = vector.load %arg9[%c2_171, %c0_172, %c0_173] : memref<4x8x128xf32, #tpu.memory_space<vmem>>, vector<1x8x128xf32>
    %382 = vector.shape_cast %381 : vector<1x8x128xf32> to vector<8x128xf32>
    %383 = vector.shape_cast %380 : vector<8x128xf32> to vector<1x8x128xf32>
    tpu.vector_store %arg9[%c2_171, %c0_172, %c0_173], %383 {strides = array<i32>} : memref<4x8x128xf32, #tpu.memory_space<vmem>>, vector<1x8x128xf32>,
    %c2_174 = arith.constant 2 : index
    %c0_175 = arith.constant 0 : index
    %c0_176 = arith.constant 0 : index
    %384 = vector.load %arg10[%c2_174, %c0_175, %c0_176] : memref<4x8x128xf32, #tpu.memory_space<vmem>>, vector<1x8x128xf32>
    %385 = vector.shape_cast %384 : vector<1x8x128xf32> to vector<8x128xf32>
    %386 = arith.addf %385, %323 : vector<8x128xf32>
    %c2_177 = arith.constant 2 : index
    %c0_178 = arith.constant 0 : index
    %c0_179 = arith.constant 0 : index
    %387 = vector.load %arg10[%c2_177, %c0_178, %c0_179] : memref<4x8x128xf32, #tpu.memory_space<vmem>>, vector<1x8x128xf32>
    %388 = vector.shape_cast %387 : vector<1x8x128xf32> to vector<8x128xf32>
    %389 = vector.shape_cast %386 : vector<8x128xf32> to vector<1x8x128xf32>
    tpu.vector_store %arg10[%c2_177, %c0_178, %c0_179], %389 {strides = array<i32>} : memref<4x8x128xf32, #tpu.memory_space<vmem>>, vector<1x8x128xf32>,
    %c3_180 = arith.constant 3 : index
    %c0_181 = arith.constant 0 : index
    %c0_182 = arith.constant 0 : index
    %390 = vector.load %arg8[%c3_180, %c0_181, %c0_182] : memref<4x8x128xf32, #tpu.memory_space<vmem>>, vector<1x8x128xf32>
    %391 = vector.shape_cast %390 : vector<1x8x128xf32> to vector<8x128xf32>
    %392 = arith.addf %391, %329 : vector<8x128xf32>
    %c3_183 = arith.constant 3 : index
    %c0_184 = arith.constant 0 : index
    %c0_185 = arith.constant 0 : index
    %393 = vector.load %arg8[%c3_183, %c0_184, %c0_185] : memref<4x8x128xf32, #tpu.memory_space<vmem>>, vector<1x8x128xf32>
    %394 = vector.shape_cast %393 : vector<1x8x128xf32> to vector<8x128xf32>
    %395 = vector.shape_cast %392 : vector<8x128xf32> to vector<1x8x128xf32>
    tpu.vector_store %arg8[%c3_183, %c0_184, %c0_185], %395 {strides = array<i32>} : memref<4x8x128xf32, #tpu.memory_space<vmem>>, vector<1x8x128xf32>,
    %c3_186 = arith.constant 3 : index
    %c0_187 = arith.constant 0 : index
    %c0_188 = arith.constant 0 : index
    %396 = vector.load %arg9[%c3_186, %c0_187, %c0_188] : memref<4x8x128xf32, #tpu.memory_space<vmem>>, vector<1x8x128xf32>
    %397 = vector.shape_cast %396 : vector<1x8x128xf32> to vector<8x128xf32>
    %398 = arith.addf %397, %331 : vector<8x128xf32>
    %c3_189 = arith.constant 3 : index
    %c0_190 = arith.constant 0 : index
    %c0_191 = arith.constant 0 : index
    %399 = vector.load %arg9[%c3_189, %c0_190, %c0_191] : memref<4x8x128xf32, #tpu.memory_space<vmem>>, vector<1x8x128xf32>
    %400 = vector.shape_cast %399 : vector<1x8x128xf32> to vector<8x128xf32>
    %401 = vector.shape_cast %398 : vector<8x128xf32> to vector<1x8x128xf32>
    tpu.vector_store %arg9[%c3_189, %c0_190, %c0_191], %401 {strides = array<i32>} : memref<4x8x128xf32, #tpu.memory_space<vmem>>, vector<1x8x128xf32>,
    %c3_192 = arith.constant 3 : index
    %c0_193 = arith.constant 0 : index
    %c0_194 = arith.constant 0 : index
    %402 = vector.load %arg10[%c3_192, %c0_193, %c0_194] : memref<4x8x128xf32, #tpu.memory_space<vmem>>, vector<1x8x128xf32>
    %403 = vector.shape_cast %402 : vector<1x8x128xf32> to vector<8x128xf32>
    %404 = arith.addf %403, %335 : vector<8x128xf32>
    %c3_195 = arith.constant 3 : index
    %c0_196 = arith.constant 0 : index
    %c0_197 = arith.constant 0 : index
    %405 = vector.load %arg10[%c3_195, %c0_196, %c0_197] : memref<4x8x128xf32, #tpu.memory_space<vmem>>, vector<1x8x128xf32>
    %406 = vector.shape_cast %405 : vector<1x8x128xf32> to vector<8x128xf32>
    %407 = vector.shape_cast %404 : vector<8x128xf32> to vector<1x8x128xf32>
    tpu.vector_store %arg10[%c3_195, %c0_196, %c0_197], %407 {strides = array<i32>} : memref<4x8x128xf32, #tpu.memory_space<vmem>>, vector<1x8x128xf32>,
    %c0_i32_198 = arith.constant 0 : i32
    %408 = arith.cmpi eq, %arg2, %c0_i32_198 : i32
    %409 = arith.extui %408 : i1 to i32
    %c0_i32_199 = arith.constant 0 : i32
    %410 = arith.cmpi ne, %409, %c0_i32_199 : i32
    scf.if %410 {
      %c0_200 = arith.constant 0 : index
      %c0_201 = arith.constant 0 : index
      %c0_202 = arith.constant 0 : index
      %411 = vector.load %arg8[%c0_200, %c0_201, %c0_202] : memref<4x8x128xf32, #tpu.memory_space<vmem>>, vector<4x8x128xf32>
      %cst_203 = arith.constant dense<0.000000e+00> : vector<4x8xf32>
      %412 = vector.multi_reduction <add>, %411, %cst_203 [2] : vector<4x8x128xf32> to vector<4x8xf32>
      %cst_204 = arith.constant dense<0.000000e+00> : vector<4xf32>
      %413 = vector.multi_reduction <add>, %412, %cst_204 [1] : vector<4x8xf32> to vector<4xf32>
      %414 = vector.shape_cast %413 : vector<4xf32> to vector<4x1xf32>
      %c0_205 = arith.constant 0 : index
      %c0_206 = arith.constant 0 : index
      %c0_207 = arith.constant 0 : index
      %415 = vector.load %arg5[%c0_205, %c0_206, %c0_207] : memref<1x4x1xf32, #tpu.memory_space<vmem>>, vector<1x4x1xf32>
      %416 = vector.shape_cast %415 : vector<1x4x1xf32> to vector<4x1xf32>
      %417 = vector.shape_cast %414 : vector<4x1xf32> to vector<1x4x1xf32>
      tpu.vector_store %arg5[%c0_205, %c0_206, %c0_207], %417 {strides = array<i32>} : memref<1x4x1xf32, #tpu.memory_space<vmem>>, vector<1x4x1xf32>,
      %c0_208 = arith.constant 0 : index
      %c0_209 = arith.constant 0 : index
      %c0_210 = arith.constant 0 : index
      %418 = vector.load %arg9[%c0_208, %c0_209, %c0_210] : memref<4x8x128xf32, #tpu.memory_space<vmem>>, vector<4x8x128xf32>
      %cst_211 = arith.constant dense<0.000000e+00> : vector<4x8xf32>
      %419 = vector.multi_reduction <add>, %418, %cst_211 [2] : vector<4x8x128xf32> to vector<4x8xf32>
      %cst_212 = arith.constant dense<0.000000e+00> : vector<4xf32>
      %420 = vector.multi_reduction <add>, %419, %cst_212 [1] : vector<4x8xf32> to vector<4xf32>
      %421 = vector.shape_cast %420 : vector<4xf32> to vector<4x1xf32>
      %c0_213 = arith.constant 0 : index
      %c0_214 = arith.constant 0 : index
      %c0_215 = arith.constant 0 : index
      %422 = vector.load %arg6[%c0_213, %c0_214, %c0_215] : memref<1x4x1xf32, #tpu.memory_space<vmem>>, vector<1x4x1xf32>
      %423 = vector.shape_cast %422 : vector<1x4x1xf32> to vector<4x1xf32>
      %424 = vector.shape_cast %421 : vector<4x1xf32> to vector<1x4x1xf32>
      tpu.vector_store %arg6[%c0_213, %c0_214, %c0_215], %424 {strides = array<i32>} : memref<1x4x1xf32, #tpu.memory_space<vmem>>, vector<1x4x1xf32>,
      %c0_216 = arith.constant 0 : index
      %c0_217 = arith.constant 0 : index
      %c0_218 = arith.constant 0 : index
      %425 = vector.load %arg10[%c0_216, %c0_217, %c0_218] : memref<4x8x128xf32, #tpu.memory_space<vmem>>, vector<4x8x128xf32>
      %cst_219 = arith.constant dense<0.000000e+00> : vector<4x8xf32>
      %426 = vector.multi_reduction <add>, %425, %cst_219 [2] : vector<4x8x128xf32> to vector<4x8xf32>
      %cst_220 = arith.constant dense<0.000000e+00> : vector<4xf32>
      %427 = vector.multi_reduction <add>, %426, %cst_220 [1] : vector<4x8xf32> to vector<4xf32>
      %428 = vector.shape_cast %427 : vector<4xf32> to vector<4x1xf32>
      %c0_221 = arith.constant 0 : index
      %c0_222 = arith.constant 0 : index
      %c0_223 = arith.constant 0 : index
      %429 = vector.load %arg7[%c0_221, %c0_222, %c0_223] : memref<1x4x1xf32, #tpu.memory_space<vmem>>, vector<1x4x1xf32>
      %430 = vector.shape_cast %429 : vector<1x4x1xf32> to vector<4x1xf32>
      %431 = vector.shape_cast %428 : vector<4x1xf32> to vector<1x4x1xf32>
      tpu.vector_store %arg7[%c0_221, %c0_222, %c0_223], %431 {strides = array<i32>} : memref<1x4x1xf32, #tpu.memory_space<vmem>>, vector<1x4x1xf32>,
    } else {
    }
    return
  }
  func.func @transform_0(%arg0: i32, %arg1: i32, %arg2: i32) -> (i32, i32, i32, i32) {
    %c1_i32 = arith.constant 1 : i32
    %0 = arith.muli %arg1, %c1_i32 : i32
    %1 = arith.addi %0, %arg2 : i32
    %c0_i32 = arith.constant 0 : i32
    %c0_i32_0 = arith.constant 0 : i32
    %c0_i32_1 = arith.constant 0 : i32
    return %arg0, %1, %c0_i32, %c0_i32_0 : i32, i32, i32, i32
  }
  func.func @transform_1(%arg0: i32, %arg1: i32, %arg2: i32) -> (i32, i32, i32, i32) {
    %c1_i32 = arith.constant 1 : i32
    %0 = arith.muli %arg1, %c1_i32 : i32
    %1 = arith.addi %0, %arg2 : i32
    %c0_i32 = arith.constant 0 : i32
    %c0_i32_0 = arith.constant 0 : i32
    %c0_i32_1 = arith.constant 0 : i32
    return %arg0, %1, %c0_i32, %c0_i32_0 : i32, i32, i32, i32
  }
  func.func @transform_2(%arg0: i32, %arg1: i32, %arg2: i32) -> (i32, i32, i32) {
    %c1_i32 = arith.constant 1 : i32
    %0 = arith.muli %arg0, %c1_i32 : i32
    %1 = arith.addi %0, %arg1 : i32
    %c0_i32 = arith.constant 0 : i32
    %c0_i32_0 = arith.constant 0 : i32
    %c0_i32_1 = arith.constant 0 : i32
    return %1, %c0_i32, %c0_i32_0 : i32, i32, i32
  }
  func.func @transform_3(%arg0: i32, %arg1: i32, %arg2: i32) -> (i32, i32, i32) {
    %c1_i32 = arith.constant 1 : i32
    %0 = arith.muli %arg0, %c1_i32 : i32
    %1 = arith.addi %0, %arg1 : i32
    %c0_i32 = arith.constant 0 : i32
    %c0_i32_0 = arith.constant 0 : i32
    %c0_i32_1 = arith.constant 0 : i32
    return %1, %c0_i32, %c0_i32_0 : i32, i32, i32
  }
  func.func @transform_4(%arg0: i32, %arg1: i32, %arg2: i32) -> (i32, i32, i32) {
    %c1_i32 = arith.constant 1 : i32
    %0 = arith.muli %arg0, %c1_i32 : i32
    %1 = arith.addi %0, %arg1 : i32
    %c0_i32 = arith.constant 0 : i32
    %c0_i32_0 = arith.constant 0 : i32
    %c0_i32_1 = arith.constant 0 : i32
    return %1, %c0_i32, %c0_i32_0 : i32, i32, i32
  }
}

</mosaic_0001>

<bundles_post_ra>
// kernel: weighted_dice_loss.1
= control target key start
LH: loop header
LB: loop body
LE: loop exit
PB: predicated region body
PF: predicated region fallthrough
CT: control target
= control target key end

     0   :  { %s1071_s15 = smov 0   ;;  %s1073_s16 = smov 0   ;;  %s1390_s0 = inlined_call_operand.vmem [shape: f32[8,4,8,128], index: 0, kind: input, shape index: {}]   ;;  %s1391_s1 = inlined_call_operand.vmem [shape: s8[2,1,32,128], index: 1, kind: input, shape index: {}]   ;;  %s1392_s2 = inlined_call_operand.vmem [shape: f32[2,4,1], index: 2, kind: output, shape index: {0}]   ;;  %s1393_s3 = inlined_call_operand.vmem [shape: f32[2,4,1], index: 3, kind: output, shape index: {1}]   ;;  %s1394_s4 = inlined_call_operand.vmem [shape: f32[2,4,1], index: 4, kind: output, shape index: {2}]  }
   0x1   :  { %s1075_s17 = smov 0  }
   0x2 LB: > { %s34_s18 = sadd.s32 1, %s1039_s16  ;;  %p930_p0 = scmp.ge.s32.totalorder %s1043_s17, 1  ;;  %s1043_s17 = sphi %s1075_s17, %s15_s17   ;;  %s1039_s16 = sphi %s1073_s16, %s1424_s16   ;;  %s1035_s15 = sphi %s1071_s15, %s1423_s15  }
   0x3   : > { %p36_p1 = scmp.ge.s32.totalorder %s34_s18, 2  ;;  %p223_p2 = scmp.lt.s32.totalorder %s1043_s17, 3 }
   0x5   : > { %s1426_s18 = smov (%p36_p1, %s34_s18), 0  ;;  %p224_p3 = pnand %p930_p0, %p223_p2 }
   0x6   : > { %p288_p4 = scmp.lt.s32.totalorder (!%p224_p3), %s1035_s15, 1  ;;  %s931_s19 = sshll.u32 (!%p224_p3), %s1035_s15, 2 }
   0x7   : > { %227 = sbr.rel (%p224_p3) target bundleno = 343 (0x157), region = 28  ;;  %p276_p5 = scmp.lt.s32.totalorder (!%p224_p3), %s931_s19, 7 }
   0xc   : > { %s1428_s15 = smov (!%p288_p4, %s1035_s15), 1  ;;  %s1430_s19 = smov (!%p276_p5, %s931_s19), 7  ;;  %v1045_v7 = vmov 0.0  }
   0xd   : > { %s934_s20 = sshll.u32 %s1428_s15, 3  ;;  %s955_s24 = sshll.u32 %s1430_s19, 5 }
   0xe   : > { %s294_s23 = scalar_lea.vmem %s1391_s1, %s934_s20  ;;  %s1098_s27 = scalar_lea.vmem %s1390_s0, %s955_s24 }
   0xf   : > { %v330_v0 = vld [vmem:[%s294_s23] sm:$0xff]  ;;  %v941_v19 = vld [vmem:[%s1098_s27 + $0x8] sm:$0xff]  ;;  %v1140_v21 = vld [vmem:[%s1098_s27 + $0x10] sm:$0xff]  ;;  %s935_s28 = sshll.u32 %s1428_s15, 2 }
  0x10   : > { %v1100_v1 = vunpack.c.0.s8 %v330_v0  ;;  %v1102_v2 = vunpack.c.1.s8 %v330_v0  ;;  %v1104_v3 = vunpack.c.2.s8 %v330_v0  ;;  %v1106_v4 = vunpack.c.3.s8 %v330_v0  ;;  %v335_v5 = vld [vmem:[%s1098_s27] sm:$0xff]  ;;  %v942_v20 = vld [vmem:[%s1098_s27 + $0x28] sm:$0xff]  ;;  %v1147_v23 = vld [vmem:[%s1098_s27 + $0x30] sm:$0xff]  ;;  %s312_s5 = scalar_lea.vmem %s1394_s4, %s935_s28  ;;  %s300_s8 = scalar_lea.vmem %s1392_s2, %s935_s28 }
  0x11   : > { %v938_v6 = vld [vmem:[%s1098_s27 + $0x20] sm:$0xff]  ;;  %v1150_v24 = vld [vmem:[%s1098_s27 + $0x18] sm:$0xff]  ;;  %v943_v31 = vld [vmem:[%s1098_s27 + $0x48] sm:$0xff]  ;;  %v416_v34 = vmax.f32 %v941_v19, %v942_v20  ;;  %v490_v35 = vmax.f32 %v1140_v21, %v1147_v23  ;;  %s306_s11 = scalar_lea.vmem %s1393_s3, %s935_s28 }
  0x12   : > { %vm377_vm0 = vcmp.eq.s32.totalorder %v1100_v1, 0  ;;  %vm451_vm1 = vcmp.eq.s32.totalorder %v1102_v2, 0  ;;  %vm525_vm2 = vcmp.eq.s32.totalorder %v1104_v3, 0  ;;  %vm599_vm3 = vcmp.eq.s32.totalorder %v1106_v4, 0  ;;  %v939_v15 = vld [vmem:[%s1098_s27 + $0x40] sm:$0xff]  ;;  %v1153_v25 = vld [vmem:[%s1098_s27 + $0x38] sm:$0xff] }
  0x13   : > { %v382_v8 = vsel %vm377_vm0, 1.0, %v1045_v7  ;;  %v456_v9 = vsel %vm451_vm1, 1.0, %v1045_v7  ;;  %v530_v10 = vsel %vm525_vm2, 1.0, %v1045_v7  ;;  %vm385_vm4 = vcmp.eq.s32.totalorder %v1100_v1, 1  ;;  %v940_v29 = vld [vmem:[%s1098_s27 + $0x60] sm:$0xff]  ;;  %v947_v32 = vld [vmem:[%s1098_s27 + $0x50] sm:$0xff] }
  0x14   : > { %v457_v11 = vadd.f32 %v456_v9, %v382_v8  ;;  %vm459_vm5 = vcmp.eq.s32.totalorder %v1102_v2, 1  ;;  %vm533_vm6 = vcmp.eq.s32.totalorder %v1104_v3, 1  ;;  %v604_v12 = vsel %vm599_vm3, 1.0, %v1045_v7  ;;  %v1169_v36 = vld [vmem:[%s1098_s27 + $0x58] sm:$0xff]  ;;  %v944_v41 = vld [vmem:[%s1098_s27 + $0x68] sm:$0xff]  ;;  %v948_v42 = vld [vmem:[%s1098_s27 + $0x70] sm:$0xff] }
  0x15   : > { %v390_v13 = vsel %vm385_vm4, 1.0, %v1045_v7  ;;  %v464_v14 = vsel %vm459_vm5, 1.0, %v1045_v7  ;;  %v342_v16 = vmax.f32 %v335_v5, %v938_v6  ;;  %vm1403_vm7 = vcmp.eq.s32.totalorder %v1100_v1, 2  ;;  %v952_v54 = vld [vmem:[%s1098_s27 + $0x78] sm:$0xff] }
  0x16   : > { %v531_v17 = vadd.f32 %v530_v10, %v457_v11  ;;  %v465_v18 = vadd.f32 %v464_v14, %v390_v13  ;;  %v538_v22 = vsel %vm533_vm6, 1.0, %v1045_v7  ;;  %vm1402_vm8 = vcmp.eq.s32.totalorder %v1102_v2, 2 }
  0x17   : > { %vm1401_vm9 = vcmp.eq.s32.totalorder %v1106_v4, 1  ;;  %v398_v27 = vsel %vm1403_vm7, 1.0, %v1045_v7  ;;  %v472_v28 = vsel %vm1402_vm8, 1.0, %v1045_v7  ;;  %vm1400_vm10 = vcmp.eq.s32.totalorder %v1104_v3, 2 }
  0x18   : > { %v605_v26 = vadd.f32 %v604_v12, %v531_v17  ;;  %v343_v30 = vmax.f32 %v342_v16, %v939_v15  ;;  %v539_v33 = vadd.f32 %v538_v22, %v465_v18  ;;  %v564_v37 = vmax.f32 %v1150_v24, %v1153_v25 }
  0x19   : > { %v612_v38 = vsel %vm1401_vm9, 1.0, %v1045_v7  ;;  %v473_v39 = vadd.f32 %v472_v28, %v398_v27  ;;  %v546_v43 = vsel %vm1400_vm10, 1.0, %v1045_v7  ;;  %vm1398_vm11 = vcmp.eq.s32.totalorder %v1106_v4, 2 }
  0x1a   : > { %745 = vadd.xlane.f32.xlu2 %v605_v26  ;;  %v344_v40 = vmax.f32 %v343_v30, %v940_v29  ;;  %v417_v44 = vmax.f32 %v416_v34, %v943_v31  ;;  %v491_v45 = vmax.f32 %v490_v35, %v947_v32  ;;  %v565_v49 = vmax.f32 %v564_v37, %v1169_v36 }
  0x1b   : > { %v613_v50 = vadd.f32 %v612_v38, %v539_v33  ;;  %v547_v55 = vadd.f32 %v546_v43, %v473_v39  ;;  %v620_v10 = vsel %vm1398_vm11, 1.0, %v1045_v7  ;;  %vm1399_vm12 = vcmp.eq.s32.totalorder %v1100_v1, 3 }
  0x1c   : > { %v345_v46 = vsub.f32 %v335_v5, %v344_v40  ;;  %v348_v47 = vsub.f32 %v938_v6, %v344_v40  ;;  %v351_v48 = vsub.f32 %v939_v15, %v344_v40  ;;  %v354_v51 = vsub.f32 %v940_v29, %v344_v40 }
  0x1d   : > { %v418_v52 = vmax.f32 %v417_v44, %v944_v41  ;;  %v492_v53 = vmax.f32 %v491_v45, %v948_v42  ;;  %v566_v5 = vmax.f32 %v565_v49, %v952_v54  ;;  %v621_v17 = vadd.f32 %v620_v10, %v547_v55 }
  0x1e   : > { %v346_v56 = vmul.f32 1.442695, %v345_v46  ;;  %v349_v57 = vmul.f32 1.442695, %v348_v47  ;;  %v352_v58 = vmul.f32 1.442695, %v351_v48 }
  0x1f   : > { %v355_v59 = vmul.f32 1.442695, %v354_v51  ;;  %v419_v60 = vsub.f32 %v941_v19, %v418_v52  ;;  %v422_v61 = vsub.f32 %v942_v20, %v418_v52  ;;  %v425_v62 = vsub.f32 %v943_v31, %v418_v52 }
  0x20   : > { %981 = vpow2.f32 %v346_v56  ;;  %v428_v63 = vsub.f32 %v944_v41, %v418_v52  ;;  %v493_v0 = vsub.f32 %v1140_v21, %v492_v53  ;;  %v496_v9 = vsub.f32 %v1147_v23, %v492_v53 }
  0x21   : > { %983 = vpow2.f32 %v349_v57  ;;  %v420_v6 = vmul.f32 1.442695, %v419_v60  ;;  %v423_v8 = vmul.f32 1.442695, %v422_v61  ;;  %v426_v11 = vmul.f32 1.442695, %v425_v62 }
  0x22   : > { %747 = vadd.xlane.f32.xlu2 %v613_v50  ;;  %985 = vpow2.f32 %v352_v58  ;;  %v429_v12 = vmul.f32 1.442695, %v428_v63  ;;  %v499_v13 = vsub.f32 %v947_v32, %v492_v53  ;;  %v502_v14 = vsub.f32 %v948_v42, %v492_v53 }
  0x23   : > { %987 = vpow2.f32 %v355_v59  ;;  %v494_v15 = vmul.f32 1.442695, %v493_v0  ;;  %v567_v16 = vsub.f32 %v1150_v24, %v566_v5  ;;  %v497_v18 = vmul.f32 1.442695, %v496_v9 }
  0x24   : > { %989 = vpow2.f32 %v420_v6  ;;  %v570_v19 = vsub.f32 %v1153_v25, %v566_v5  ;;  %v500_v21 = vmul.f32 1.442695, %v499_v13  ;;  %v503_v23 = vmul.f32 1.442695, %v502_v14 }
  0x25   : > { %991 = vpow2.f32 %v423_v8  ;;  %v573_v26 = vsub.f32 %v1169_v36, %v566_v5  ;;  %v568_v28 = vmul.f32 1.442695, %v567_v16  ;;  %v576_v29 = vsub.f32 %v952_v54, %v566_v5 }
  0x26   : > { %v1191_v20 = vpop.eup %981  ;;  %993 = vpow2.f32 %v426_v11  ;;  %v571_v25 = vmul.f32 1.442695, %v570_v19  ;;  %vm1396_vm13 = vcmp.eq.s32.totalorder %v1102_v2, 3  ;;  %v406_v43 = vsel %vm1399_vm12, 1.0, %v1045_v7 }
  0x27   : > { %v1193_v22 = vpop.eup %983  ;;  %995 = vpow2.f32 %v429_v12  ;;  %v574_v34 = vmul.f32 1.442695, %v573_v26  ;;  %v577_v38 = vmul.f32 1.442695, %v576_v29  ;;  %v480_v44 = vsel %vm1396_vm13, 1.0, %v1045_v7 }
  0x28   : > { %v1196_v27 = vpop.eup %985  ;;  %v357_v24 = vadd.f32 %v1193_v22, %v1191_v20  ;;  %997 = vpow2.f32 %v494_v15  ;;  %v481_v49 = vadd.f32 %v480_v44, %v406_v43  ;;  %vm1395_vm14 = vcmp.eq.s32.totalorder %v1104_v3, 3 }
  0x29   : > { %v1200_v30 = vpop.eup %987  ;;  %999 = vpow2.f32 %v497_v18  ;;  %vm1397_vm15 = vcmp.eq.s32.totalorder %v1106_v4, 3  ;;  %v554_v52 = vsel %vm1395_vm14, 1.0, %v1045_v7  ;;  %vm360_vm11 = vcmp.ge.s32.totalorder %v1100_v1, 0 }
  0x2a   : > { %749 = vadd.xlane.f32.xlu2 %v621_v17  ;;  %v1202_v31 = vpop.eup %989  ;;  %v358_v32 = vadd.f32 %v1196_v27, %v357_v24  ;;  %1001 = vpow2.f32 %v500_v21  ;;  %v555_v57 = vadd.f32 %v554_v52, %v481_v49  ;;  %v628_v58 = vsel %vm1397_vm15, 1.0, %v1045_v7 }
  0x2b   : > { %v1205_v33 = vpop.eup %991  ;;  %1003 = vpow2.f32 %v503_v23  ;;  %vm434_vm7 = vcmp.ge.s32.totalorder %v1102_v2, 0 }
  0x2c   : > { %v1207_v35 = vpop.eup %993  ;;  %v359_v36 = vadd.f32 %v1200_v30, %v358_v32  ;;  %v431_v37 = vadd.f32 %v1205_v33, %v1202_v31  ;;  %1005 = vpow2.f32 %v568_v28  ;;  %v629_v6 = vadd.f32 %v628_v58, %v555_v57 }
  0x2d   : > { %v1212_v39 = vpop.eup %995  ;;  %1007 = vpow2.f32 %v571_v25 }
  0x2e   : > { %v1216_v40 = vpop.eup %997  ;;  %1009 = vrcp.f32 %v359_v36  ;;  %v432_v42 = vadd.f32 %v1207_v35, %v431_v37  ;;  %vm366_vm14 = vweird.f32 %v359_v36  ;;  %v370_v62 = vand.u32 2147483647, %v359_v36 }
  0x2f   : > { %v1218_v41 = vpop.eup %999  ;;  %1011 = vpow2.f32 %v574_v34  ;;  %v372_v63 = vand.u32 2147483648, %v359_v36 }
  0x30   : > { %v1227_v45 = vpop.eup %1001  ;;  %v505_v46 = vadd.f32 %v1218_v41, %v1216_v40  ;;  %1013 = vpow2.f32 %v577_v38  ;;  %v433_v48 = vadd.f32 %v1212_v39, %v432_v42  ;;  %vm371_vm12 = vcmp.eq.f32.partialorder %v370_v62, 8.507059e+37 }
  0x31   : > { %v1231_v47 = vpop.eup %1003  ;;  %v373_v11 = vor.u32 1.1754944e-38, %v372_v63 }
  0x32   : > { %v1236_v50 = vpop.eup %1005  ;;  %v506_v51 = vadd.f32 %v1227_v45, %v505_v46  ;;  %1015 = vrcp.f32 %v433_v48  ;;  %751 = vadd.xlane.f32.xlu2 %v629_v6  ;;  %v446_v13 = vand.u32 2147483648, %v433_v48  ;;  %vm440_vm10 = vweird.f32 %v433_v48 }
  0x33   : > { %v1242_v53 = vpop.eup %1007  ;;  %v444_v17 = vand.u32 2147483647, %v433_v48 }
  0x34   : > { %v1010_v54 = vpop.eup %1009  ;;  %v507_v55 = vadd.f32 %v1231_v47, %v506_v51  ;;  %v579_v56 = vadd.f32 %v1242_v53, %v1236_v50  ;;  %v447_v24 = vor.u32 1.1754944e-38, %v446_v13 }
  0x35   : > { %v1250_v59 = vpop.eup %1011  ;;  %v362_v60 = vmul.f32 %v1010_v54, %v359_v36  ;;  %vm367_vm13 = vweird.f32 %v1010_v54 }
  0x36   : > { %v1252_v61 = vpop.eup %1013  ;;  %1017 = vrcp.f32 %v507_v55  ;;  %v580_v5 = vadd.f32 %v1250_v59, %v579_v56  ;;  %vm1258_vm15 = vmor %vm366_vm14, %vm367_vm13  ;;  %v518_v21 = vand.u32 2147483647, %v507_v55  ;;  %v520_v28 = vand.u32 2147483648, %v507_v55 }
  0x37   : > { %v363_v0 = vsub.f32 1.0, %v362_v60  ;;  %vm514_vm14 = vweird.f32 %v507_v55 }
  0x38   : > { %v1016_v8 = vpop.eup %1015  ;;  %v1256_v10 = vadd.f32 %v1252_v61, %v580_v5  ;;  %v521_v46 = vor.u32 1.1754944e-38, %v520_v28 }
  0x39   : > { %v364_v9 = vmul.f32 %v1010_v54, %v363_v0  ;;  %v436_v12 = vmul.f32 %v1016_v8, %v433_v48  ;;  %vm441_vm9 = vweird.f32 %v1016_v8 }
  0x3a   : > { %1019 = vrcp.f32 %v1256_v10  ;;  %vm1270_vm13 = vmor %vm440_vm10, %vm441_vm9  ;;  %vm588_vm10 = vweird.f32 %v1256_v10  ;;  %v592_v51 = vand.u32 2147483647, %v1256_v10  ;;  %v594_v52 = vand.u32 2147483648, %v1256_v10 }
  0x3b   : > { %v365_v14 = vadd.f32 %v1010_v54, %v364_v9  ;;  %v437_v16 = vsub.f32 1.0, %v436_v12 }
  0x3c   : > { %v1018_v15 = vpop.eup %1017 }
  0x3d   : > { %v369_v18 = vsel %vm1258_vm15, %v1010_v54, %v365_v14  ;;  %v510_v19 = vmul.f32 %v1018_v15, %v507_v55  ;;  %v438_v26 = vmul.f32 %v1016_v8, %v437_v16  ;;  %vm515_vm8 = vweird.f32 %v1018_v15 }
  0x3e   : > { %v374_v23 = vsel %vm371_vm12, %v373_v11, %v369_v18  ;;  %vm445_vm15 = vcmp.eq.f32.partialorder %v444_v17, 8.507059e+37  ;;  %vm508_vm12 = vcmp.ge.s32.totalorder %v1104_v3, 0  ;;  %vm1284_vm9 = vmor %vm514_vm14, %vm515_vm8  ;;  %vm582_vm8 = vcmp.ge.s32.totalorder %v1106_v4, 0 }
  0x3f   : > { %v1268_v29 = vsel %vm360_vm11, %v374_v23, 0.0  ;;  %v511_v32 = vsub.f32 1.0, %v510_v19  ;;  %v439_v34 = vadd.f32 %v1016_v8, %v438_v26  ;;  %vm1278_vm11 = vcmp.eq.f32.partialorder %v518_v21, 8.507059e+37 }
  0x40   : > { %v1020_v36 = vpop.eup %1019  ;;  %v376_v37 = vmul.f32 %v1191_v20, %v1268_v29  ;;  %v384_v56 = vmul.f32 %v1193_v22, %v1268_v29  ;;  %vm1420_vm14 = vcmp.eq.s32.totalorder %v1102_v2, 3 }
  0x41   : > { %v512_v38 = vmul.f32 %v1018_v15, %v511_v32  ;;  %v443_v43 = vsel %vm1270_vm13, %v1016_v8, %v439_v34  ;;  %v584_v48 = vmul.f32 %v1020_v36, %v1256_v10  ;;  %vm589_vm13 = vweird.f32 %v1020_v36 }
  0x42   : > { %v448_v20 = vsel %vm445_vm15, %v447_v24, %v443_v43  ;;  %v378_v57 = vsel %vm377_vm0, %v376_v37, 0.0  ;;  %v380_v62 = vmul.f32 %v376_v37, %v376_v37  ;;  %vm1310_vm0 = vmor %vm588_vm10, %vm589_vm13  ;;  %v595_v8 = vor.u32 1.1754944e-38, %v594_v52 }
  0x43   : > { %v513_v49 = vadd.f32 %v1018_v15, %v512_v38  ;;  %v449_v54 = vsel %vm434_vm7, %v448_v20, 0.0  ;;  %v585_v55 = vsub.f32 1.0, %v584_v48  ;;  %vm593_vm7 = vcmp.eq.f32.partialorder %v592_v51, 8.507059e+37 }
  0x44   : > { %v450_v58 = vmul.f32 %v1202_v31, %v449_v54  ;;  %v458_v5 = vmul.f32 %v1205_v33, %v449_v54  ;;  %v388_v14 = vmul.f32 %v384_v56, %v384_v56  ;;  %v392_v24 = vmul.f32 %v1196_v27, %v1268_v29 }
  0x45   : > { %v517_v60 = vsel %vm1284_vm9, %v1018_v15, %v513_v49  ;;  %v586_v0 = vmul.f32 %v1020_v36, %v585_v55  ;;  %v466_v34 = vmul.f32 %v1207_v35, %v449_v54  ;;  %v400_v52 = vmul.f32 %v1200_v30, %v1268_v29 }
  0x46   : > { %v522_v63 = vsel %vm1278_vm11, %v521_v46, %v517_v60  ;;  %v452_v6 = vsel %vm451_vm1, %v450_v58, 0.0  ;;  %v454_v9 = vmul.f32 %v450_v58, %v450_v58  ;;  %v462_v17 = vmul.f32 %v458_v5, %v458_v5 }
  0x47   : > { %v523_v22 = vsel %vm508_vm12, %v522_v63, 0.0  ;;  %v453_v7 = vadd.f32 %v452_v6, %v378_v57  ;;  %v587_v12 = vadd.f32 %v1020_v36, %v586_v0  ;;  %v460_v19 = vsel %vm459_vm5, %v458_v5, 0.0 }
  0x48   : > { %v524_v11 = vmul.f32 %v1216_v40, %v523_v22  ;;  %v455_v33 = vadd.f32 %v454_v9, %v380_v62  ;;  %v532_v13 = vmul.f32 %v1218_v41, %v523_v22  ;;  %v386_v40 = vsel %vm385_vm4, %v384_v56, 0.0 }
  0x49   : > { %v591_v15 = vsel %vm1310_vm0, %v1020_v36, %v587_v12  ;;  %v461_v28 = vadd.f32 %v460_v19, %v386_v40  ;;  %v463_v32 = vadd.f32 %v462_v17, %v388_v14  ;;  %vm1414_vm1 = vcmp.eq.s32.totalorder %v1100_v1, 2 }
  0x4a   : > { %v526_v10 = vsel %vm525_vm2, %v524_v11, 0.0  ;;  %v528_v16 = vmul.f32 %v524_v11, %v524_v11  ;;  %v596_v18 = vsel %vm593_vm7, %v595_v8, %v591_v15  ;;  %v534_v25 = vsel %vm533_vm6, %v532_v13, 0.0 }
  0x4b   : > { %v527_v21 = vadd.f32 %v526_v10, %v453_v7  ;;  %v597_v23 = vsel %vm582_vm8, %v596_v18, 0.0  ;;  %v536_v42 = vmul.f32 %v532_v13, %v532_v13  ;;  %v394_v44 = vsel %vm1414_vm1, %v392_v24, 0.0 }
  0x4c   : > { %v598_v41 = vmul.f32 %v1236_v50, %v597_v23  ;;  %v529_v26 = vadd.f32 %v528_v16, %v455_v33  ;;  %v606_v38 = vmul.f32 %v1242_v53, %v597_v23  ;;  %v535_v27 = vadd.f32 %v534_v25, %v461_v28 }
  0x4d   : > { %vm1415_vm2 = vcmp.eq.s32.totalorder %v1102_v2, 2  ;;  %v540_v48 = vmul.f32 %v1227_v45, %v523_v22  ;;  %v396_v35 = vmul.f32 %v392_v24, %v392_v24  ;;  %v537_v49 = vadd.f32 %v536_v42, %v463_v32 }
  0x4e   : > { %v600_v36 = vsel %vm599_vm3, %v598_v41, 0.0  ;;  %v602_v37 = vmul.f32 %v598_v41, %v598_v41  ;;  %v468_v46 = vsel %vm1415_vm2, %v466_v34, 0.0  ;;  %vm1416_vm3 = vcmp.eq.s32.totalorder %v1106_v4, 1 }
  0x4f   : > { %v601_v43 = vadd.f32 %v600_v36, %v527_v21  ;;  %v608_v20 = vsel %vm1416_vm3, %v606_v38, 0.0  ;;  %v610_v53 = vmul.f32 %v606_v38, %v606_v38  ;;  %v470_v51 = vmul.f32 %v466_v34, %v466_v34 }
  0x50   : > { %v603_v50 = vadd.f32 %v602_v37, %v529_v26  ;;  %v609_v55 = vadd.f32 %v608_v20, %v535_v27  ;;  %v469_v56 = vadd.f32 %v468_v46, %v394_v44  ;;  %v614_v57 = vmul.f32 %v1250_v59, %v597_v23 }
  0x51   : > { %682 = vadd.xlane.f32.xlu0 %v601_v43  ;;  %v474_v58 = vmul.f32 %v1212_v39, %v449_v54  ;;  %v611_v60 = vadd.f32 %v610_v53, %v537_v49  ;;  %vm1417_vm4 = vcmp.eq.s32.totalorder %v1104_v3, 2  ;;  %v471_v62 = vadd.f32 %v470_v51, %v396_v35 }
  0x52   : > { %717 = vadd.xlane.f32.xlu1 %v603_v50  ;;  %v542_v45 = vsel %vm1417_vm4, %v540_v48, 0.0  ;;  %v544_v63 = vmul.f32 %v540_v48, %v540_v48  ;;  %vm1418_vm5 = vcmp.eq.s32.totalorder %v1100_v1, 3  ;;  %vm1419_vm6 = vcmp.eq.s32.totalorder %v1106_v4, 2 }
  0x53   : > { %v402_v0 = vsel %vm1418_vm5, %v400_v52, 0.0  ;;  %v543_v5 = vadd.f32 %v542_v45, %v469_v56  ;;  %v616_v30 = vsel %vm1419_vm6, %v614_v57, 0.0  ;;  %v618_v29 = vmul.f32 %v614_v57, %v614_v57 }
  0x54   : > { %v548_v6 = vmul.f32 %v1231_v47, %v523_v22  ;;  %v545_v59 = vadd.f32 %v544_v63, %v471_v62  ;;  %v476_v39 = vsel %vm1420_vm14, %v474_v58, 0.0  ;;  %v404_v54 = vmul.f32 %v400_v52, %v400_v52 }
  0x55   : > { %v478_v31 = vmul.f32 %v474_v58, %v474_v58  ;;  %v617_v8 = vadd.f32 %v616_v30, %v543_v5  ;;  %v477_v9 = vadd.f32 %v476_v39, %v402_v0  ;;  %vm1421_vm15 = vcmp.eq.s32.totalorder %v1104_v3, 3 }
  0x56   : > { %v550_v1 = vsel %vm1421_vm15, %v548_v6, 0.0  ;;  %v619_v7 = vadd.f32 %v618_v29, %v545_v59  ;;  %v622_v11 = vmul.f32 %v1252_v61, %v597_v23  ;;  %v552_v33 = vmul.f32 %v548_v6, %v548_v6 }
  0x57   : > { %v479_v12 = vadd.f32 %v478_v31, %v404_v54  ;;  %v551_v13 = vadd.f32 %v550_v1, %v477_v9  ;;  %vm1422_vm12 = vcmp.eq.s32.totalorder %v1106_v4, 3  ;;  %v694_v16 = vlaneseq }
  0x58   : > { %v624_v47 = vsel %vm1422_vm12, %v622_v11, 0.0  ;;  %v626_v22 = vmul.f32 %v622_v11, %v622_v11  ;;  %vm700_vm11 = vcmask 1041409   ;;  %vm702_vm9 = vcmask 1042434  }
  0x59   : > { %684 = vadd.xlane.f32.xlu0 %v609_v55  ;;  %v553_v2 = vadd.f32 %v552_v33, %v479_v12  ;;  %v625_v14 = vadd.f32 %v624_v47, %v551_v13  ;;  %v695_v17 = vand.u32 127, %v694_v16  ;;  %vm704_vm10 = vcmask 1043459  }
  0x5a   : > { %719 = vadd.xlane.f32.xlu1 %v611_v60  ;;  %vm707_vm13 = vcmask 60416   ;;  %vm711_vm0 = vcmask 3072  }
  0x5b   : > { %v627_v10 = vadd.f32 %v626_v22, %v553_v2 }
  0x61   : > { %686 = vadd.xlane.f32.xlu0 %v617_v8 }
  0x62   : > { %721 = vadd.xlane.f32.xlu1 %v619_v7 }
  0x69   : > { %688 = vadd.xlane.f32.xlu0 %v625_v14 }
  0x6a   : > { %723 = vadd.xlane.f32.xlu1 %v627_v10 }
  0x8d   : > { %v746_v15 = vpop.xlane.xlu2 %745 }
  0x8e   : > { %v757_v61 = vperm.slane %v746_v15, %v695_v17 }
  0x95   : > { %v748_v3 = vpop.xlane.xlu2 %747 }
  0x96   : > { %v758_v40 = vperm.slane %v748_v3, %v695_v17 }
  0x98   : > { %v761_v21 = vsel %vm700_vm11, %v758_v40, %v757_v61 }
  0x9d   : > { %v750_v18 = vpop.xlane.xlu2 %749 }
  0x9e   : > { %v759_v19 = vperm.slane %v750_v18, %v695_v17 }
  0xa0   : > { %v762_v23 = vsel %vm702_vm9, %v759_v19, %v761_v21 }
  0xa5   : > { %v752_v4 = vpop.xlane.xlu2 %751 }
  0xa6   : > { %v760_v41 = vperm.slane %v752_v4, %v695_v17 }
  0xa8   : > { %v763_v26 = vsel %vm704_vm10, %v760_v41, %v762_v23 }
  0xa9   : > { %v765_v24 = vsel %vm707_vm13, %v763_v26, 0.0 }
  0xaa   : > { %766 = vadd.xlane.f32.xlu2 %v765_v24 }
  0xc4   : > { %v683_v28 = vpop.xlane.xlu0 %682 }
  0xc5   : > { %v718_v25 = vpop.xlane.xlu1 %717  ;;  %v696_v50 = vperm.slane %v683_v28, %v695_v17 }
  0xc6   : > { %v729_v27 = vperm.slane %v718_v25, %v695_v17 }
  0xcc   : > { %v685_v32 = vpop.xlane.xlu0 %684 }
  0xcd   : > { %v720_v34 = vpop.xlane.xlu1 %719  ;;  %v697_v38 = vperm.slane %v685_v32, %v695_v17 }
  0xce   : > { %v730_v42 = vperm.slane %v720_v34, %v695_v17 }
  0xcf   : > { %v701_v48 = vsel %vm700_vm11, %v697_v38, %v696_v50 }
  0xd0   : > { %v733_v49 = vsel %vm700_vm11, %v730_v42, %v729_v27 }
  0xd4   : > { %v687_v36 = vpop.xlane.xlu0 %686 }
  0xd5   : > { %v722_v37 = vpop.xlane.xlu1 %721  ;;  %v698_v43 = vperm.slane %v687_v36, %v695_v17 }
  0xd6   : > { %v731_v44 = vperm.slane %v722_v37, %v695_v17 }
  0xd7   : > { %v703_v51 = vsel %vm702_vm9, %v698_v43, %v701_v48 }
  0xd8   : > { %v734_v55 = vsel %vm702_vm9, %v731_v44, %v733_v49 }
  0xdc   : > { %v689_v46 = vpop.xlane.xlu0 %688 }
  0xdd   : > { %v699_v35 = vperm.slane %v689_v46, %v695_v17  ;;  %v724_v20 = vpop.xlane.xlu1 %723 }
  0xde   : > { %v732_v53 = vperm.slane %v724_v20, %v695_v17 }
  0xdf   : > { %v705_v52 = vsel %vm704_vm10, %v699_v35, %v703_v51 }
  0xe0   : > { %v708_v56 = vsel %vm707_vm13, %v705_v52, 0.0  ;;  %v735_v57 = vsel %vm704_vm10, %v732_v53, %v734_v55 }
  0xe1   : > { %709 = vadd.xlane.f32.xlu0 %v708_v56  ;;  %v737_v58 = vsel %vm707_vm13, %v735_v57, 0.0 }
  0xe2   : > { %738 = vadd.xlane.f32.xlu1 %v737_v58 }
 0x11d   : > { %v767_v60 = vpop.xlane.xlu2 %766 }
 0x11e   : > { %768 = vst.msk [vmem:[%s312_s5] sm:$0xf] %vm711_vm0, %v767_v60 }
 0x154   : > { %v710_v45 = vpop.xlane.xlu0 %709 }
 0x155   : > { %712 = vst.msk [vmem:[%s300_s8] sm:$0xf] %vm711_vm0, %v710_v45  ;;  %v739_v62 = vpop.xlane.xlu1 %738 }
 0x156   : > { %740 = vst.msk [vmem:[%s306_s11] sm:$0xf] %vm711_vm0, %v739_v62 }
 0x157 PF: > { %s15_s17 = sadd.s32 1, %s1043_s17   ;;  %s1423_s15 = smov %s1039_s16 }
 0x158   : > { %p12_p6 = scmp.ge.s32.totalorder %s15_s17, 4   ;;  %s1424_s16 = smov %s1426_s18 }
 0x15a   :  { %14 = sbr.rel (!%p12_p6) target bundleno = 2 (0x2), region = 117 }

</bundles_post_ra>
